<compile_context>
chip_gen: v7x
topology: tpu7x:2x2x1
jax: 0.10.0
libtpu: 0.0.40
codegen_flags: <defaults>
</compile_context>

<pallas_src>
import jax
import jax.numpy as jnp
from jax.experimental import pallas as pl
from jax.experimental.pallas import tpu as pltpu


def _round_up(x, m):
    return (x + m - 1) // m * m


def autoencoder_kernel(x_ref, wgT_ref, bg_ref, whT_ref, bh_ref, o_ref):
    # x_ref  : (TB, Qp)    wgT_ref: (Qp, Kp)   bg_ref: (1, Kp)
    # whT_ref: (Kp, Qp)    bh_ref : (1, Qp)    o_ref : (TB, Qp)
    x = x_ref[...]

    # g = sigmoid(x @ Wg^T + bg); weights pre-transposed -> plain (M,K)x(K,N).
    z1 = jnp.dot(x, wgT_ref[...], preferred_element_type=jnp.float32) + bg_ref[...]
    g = 0.5 * jnp.tanh(0.5 * z1) + 0.5          # sigmoid via a single EUP tanh

    # out = sigmoid(g @ Wh^T + bh)
    z2 = jnp.dot(g, whT_ref[...], preferred_element_type=jnp.float32) + bh_ref[...]
    o_ref[...] = (0.5 * jnp.tanh(0.5 * z2) + 0.5).astype(o_ref.dtype)


def autoencoder_forward(x, wg, bg, wh, bh, *, tile_b=None, single_buffer_weights=True):
    """x: (B, Q), wg: (K, Q), bg: (K,), wh: (Q, K), bh: (Q,) -> (B, Q).

    Weights arrive in PyTorch (out_features, in_features) layout and are
    transposed once here. The batch dimension is tiled so x/out DMAs pipeline
    behind compute while the (single-buffered) weights stay resident in VMEM.
    """
    B, Q = x.shape
    K = wg.shape[0]

    # Lane-friendly padding of the feature dims.
    Qp = _round_up(Q, 128)
    Kp = _round_up(K, 128)

    # Batch tile selection.
    if tile_b is None:
        if B <= 256:
            # One big step: at these sizes per-grid-step overhead dominates and
            # a single-TC chip (v5e/v6e) has nothing to split.
            tile_b = _round_up(B, 8)
        else:
            # Big tiles amortize per-step overhead; >= 2 tiles lets megacore
            # chips (v7x) shard the parallel batch axis across TensorCores.
            tile_b = min(512, _round_up(pl.cdiv(B, 2), 8))
    tile_b = max(8, _round_up(min(tile_b, B), 8))
    Bp = _round_up(B, tile_b)
    grid_b = Bp // tile_b

    # Zero-pad everything (zeros do not change the linear algebra; padded
    # hidden columns hit zero rows of Wh^T so they contribute nothing).
    x_p = jnp.pad(x, ((0, Bp - B), (0, Qp - Q)))
    wgT_p = jnp.pad(wg.T, ((0, Qp - Q), (0, Kp - K)))          # (Qp, Kp)
    bg_p = jnp.pad(bg, (0, Kp - K)).reshape(1, Kp)
    whT_p = jnp.pad(wh.T, ((0, Kp - K), (0, Qp - Q)))          # (Kp, Qp)
    bh_p = jnp.pad(bh, (0, Qp - Q)).reshape(1, Qp)

    # VMEM budget: streamed x/out tiles (double-buffered), resident weights
    # (single- or double-buffered), sublane-padded biases, hidden temp.
    wbuf = 1 if single_buffer_weights else 2
    vmem_est = 4 * (
        2 * 2 * tile_b * Qp
        + wbuf * 2 * Qp * Kp
        + wbuf * 8 * (Qp + Kp)
        + tile_b * Kp
    )
    vmem_limit = int(min(100 * 1024 * 1024, max(2 * vmem_est, 16 * 1024 * 1024)))

    cost = pl.CostEstimate(
        flops=2 * B * Q * K * 2,                     # two matmuls
        transcendentals=B * (K + Q),                 # two tanh-sigmoids
        bytes_accessed=4 * (2 * B * Q + 2 * K * Q + K + Q),
    )

    def build(use_single_buffer):
        res_kw = {"pipeline_mode": pl.Buffered(1)} if use_single_buffer else {}
        return pl.pallas_call(
            autoencoder_kernel,
            out_shape=jax.ShapeDtypeStruct((Bp, Qp), jnp.float32),
            grid_spec=pltpu.PrefetchScalarGridSpec(
                num_scalar_prefetch=0,
                grid=(grid_b,),
                in_specs=[
                    pl.BlockSpec((tile_b, Qp), lambda i: (i, 0)),       # x: streamed
                    pl.BlockSpec((Qp, Kp), lambda i: (0, 0), **res_kw),  # Wg^T resident
                    pl.BlockSpec((1, Kp), lambda i: (0, 0), **res_kw),   # bg resident
                    pl.BlockSpec((Kp, Qp), lambda i: (0, 0), **res_kw),  # Wh^T resident
                    pl.BlockSpec((1, Qp), lambda i: (0, 0), **res_kw),   # bh resident
                ],
                out_specs=pl.BlockSpec((tile_b, Qp), lambda i: (i, 0)),
            ),
            compiler_params=pltpu.CompilerParams(
                dimension_semantics=("parallel",),   # batch tiles across TCs (v7x)
                vmem_limit_bytes=vmem_limit,
            ),
            cost_estimate=cost,
        )

    try:
        out_p = jax.block_until_ready(
            build(single_buffer_weights)(x_p, wgT_p, bg_p, whT_p, bh_p)
        )
    except Exception:
        # pipeline_mode=pl.Buffered(1) not supported in this build -> default
        # (double-buffered) specs; numerically identical.
        if not single_buffer_weights:
            raise
        out_p = build(False)(x_p, wgT_p, bg_p, whT_p, bh_p)

    return out_p[:B, :Q]


def reference_forward(x, wg, bg, wh, bh):
    g = jax.nn.sigmoid(x @ wg.T + bg)
    return jax.nn.sigmoid(g @ wh.T + bh)


if __name__ == "__main__":
    # Small shapes consistent with the module: num_question=200 (not a
    # multiple of 128 -> exercises lane padding), k=100 (module default),
    # batch=70 (not a multiple of 8 -> exercises batch padding). tile_b=32
    # forces a multi-tile grid so the streaming/pipelining path is exercised.
    B, Q, K = 70, 200, 100
    TILE_B = 32

    key = jax.random.PRNGKey(0)
    k_x, k_wg, k_bg, k_wh, k_bh = jax.random.split(key, 5)

    # PyTorch Linear default init: U[-1/sqrt(fan_in), +1/sqrt(fan_in)].
    bound_g = 1.0 / jnp.sqrt(jnp.float32(Q))
    bound_h = 1.0 / jnp.sqrt(jnp.float32(K))
    wg = jax.random.uniform(k_wg, (K, Q), jnp.float32, -bound_g, bound_g)
    bg = jax.random.uniform(k_bg, (K,), jnp.float32, -bound_g, bound_g)
    wh = jax.random.uniform(k_wh, (Q, K), jnp.float32, -bound_h, bound_h)
    bh = jax.random.uniform(k_bh, (Q,), jnp.float32, -bound_h, bound_h)

    # "user vector" inputs in [0, 1] (sparse ratings style).
    x = jax.random.uniform(k_x, (B, Q), jnp.float32, 0.0, 1.0)

    out = autoencoder_forward(x, wg, bg, wh, bh, tile_b=TILE_B)
    out = jax.block_until_ready(out)

    ref = reference_forward(x, wg, bg, wh, bh)
    assert out.shape == (B, Q)
    max_err = float(jnp.max(jnp.abs(out - ref)))
    assert jnp.allclose(out, ref, atol=1e-5, rtol=1e-5), f"mismatch vs reference (max err {max_err})"

    print("KERNEL_OK")
</pallas_src>

<mosaic_0001>
module attributes {stable_mosaic.version = 11 : i64} {
  func.func @autoencoder_kernel(%arg0: i32, %arg1: memref<32x256xf32, #tpu.memory_space<vmem>>, %arg2: memref<256x128xf32, #tpu.memory_space<vmem>>, %arg3: memref<1x128xf32, #tpu.memory_space<vmem>>, %arg4: memref<128x256xf32, #tpu.memory_space<vmem>>, %arg5: memref<1x256xf32, #tpu.memory_space<vmem>>, %arg6: memref<32x256xf32, #tpu.memory_space<vmem>>) attributes {dimension_semantics = [#tpu.dimension_semantics<parallel>], iteration_bounds = array<i64: 3>, scalar_prefetch = 0 : i64, scratch_operands = 0 : i64, tpu.core_type = #tpu.core_type<tc>, window_params = [{transform_indices = @transform_0, window_bounds = array<i64: 32, 256>}, {pipeline_mode = #tpu.pipeline_mode<synchronous>, transform_indices = @transform_1, window_bounds = array<i64: 256, 128>}, {pipeline_mode = #tpu.pipeline_mode<synchronous>, transform_indices = @transform_2, window_bounds = array<i64: 1, 128>}, {pipeline_mode = #tpu.pipeline_mode<synchronous>, transform_indices = @transform_3, window_bounds = array<i64: 128, 256>}, {pipeline_mode = #tpu.pipeline_mode<synchronous>, transform_indices = @transform_4, window_bounds = array<i64: 1, 256>}, {transform_indices = @transform_5, window_bounds = array<i64: 32, 256>}]} {
    %c0 = arith.constant 0 : index
    %c0_0 = arith.constant 0 : index
    %0 = vector.load %arg1[%c0, %c0_0] : memref<32x256xf32, #tpu.memory_space<vmem>>, vector<32x256xf32>
    %c0_1 = arith.constant 0 : index
    %c0_2 = arith.constant 0 : index
    %1 = vector.load %arg2[%c0_1, %c0_2] : memref<256x128xf32, #tpu.memory_space<vmem>>, vector<256x128xf32>
    %cst = arith.constant dense<0.000000e+00> : vector<32x128xf32>
    %2 = tpu.matmul %0, %1, %cst {dimension_numbers = #tpu.dot_dimension_numbers<[1], [0], [0], [1], [0, 0, 1, 1], [], []>} : vector<32x256xf32>, vector<256x128xf32>, vector<32x128xf32> -> vector<32x128xf32>
    %c0_3 = arith.constant 0 : index
    %c0_4 = arith.constant 0 : index
    %3 = vector.load %arg3[%c0_3, %c0_4] : memref<1x128xf32, #tpu.memory_space<vmem>>, vector<1x128xf32>
    %4 = vector.broadcast %3 : vector<1x128xf32> to vector<32x128xf32>
    %5 = arith.addf %2, %4 : vector<32x128xf32>
    %cst_5 = arith.constant 5.000000e-01 : f32
    %6 = vector.broadcast %cst_5 : f32 to vector<32x128xf32>
    %7 = arith.mulf %6, %5 : vector<32x128xf32>
    %8 = math.tanh %7 : vector<32x128xf32>
    %cst_6 = arith.constant 5.000000e-01 : f32
    %9 = vector.broadcast %cst_6 : f32 to vector<32x128xf32>
    %10 = arith.mulf %9, %8 : vector<32x128xf32>
    %cst_7 = arith.constant 5.000000e-01 : f32
    %11 = vector.broadcast %cst_7 : f32 to vector<32x128xf32>
    %12 = arith.addf %10, %11 : vector<32x128xf32>
    %c0_8 = arith.constant 0 : index
    %c0_9 = arith.constant 0 : index
    %13 = vector.load %arg4[%c0_8, %c0_9] : memref<128x256xf32, #tpu.memory_space<vmem>>, vector<128x256xf32>
    %cst_10 = arith.constant dense<0.000000e+00> : vector<32x256xf32>
    %14 = tpu.matmul %12, %13, %cst_10 {dimension_numbers = #tpu.dot_dimension_numbers<[1], [0], [0], [1], [0, 0, 1, 1], [], []>} : vector<32x128xf32>, vector<128x256xf32>, vector<32x256xf32> -> vector<32x256xf32>
    %c0_11 = arith.constant 0 : index
    %c0_12 = arith.constant 0 : index
    %15 = vector.load %arg5[%c0_11, %c0_12] : memref<1x256xf32, #tpu.memory_space<vmem>>, vector<1x256xf32>
    %16 = vector.broadcast %15 : vector<1x256xf32> to vector<32x256xf32>
    %17 = arith.addf %14, %16 : vector<32x256xf32>
    %cst_13 = arith.constant 5.000000e-01 : f32
    %18 = vector.broadcast %cst_13 : f32 to vector<32x256xf32>
    %19 = arith.mulf %18, %17 : vector<32x256xf32>
    %20 = math.tanh %19 : vector<32x256xf32>
    %cst_14 = arith.constant 5.000000e-01 : f32
    %21 = vector.broadcast %cst_14 : f32 to vector<32x256xf32>
    %22 = arith.mulf %21, %20 : vector<32x256xf32>
    %cst_15 = arith.constant 5.000000e-01 : f32
    %23 = vector.broadcast %cst_15 : f32 to vector<32x256xf32>
    %24 = arith.addf %22, %23 : vector<32x256xf32>
    %c0_16 = arith.constant 0 : index
    %c0_17 = arith.constant 0 : index
    %25 = vector.load %arg6[%c0_16, %c0_17] : memref<32x256xf32, #tpu.memory_space<vmem>>, vector<32x256xf32>
    tpu.vector_store %arg6[%c0_16, %c0_17], %24 {strides = array<i32>} : memref<32x256xf32, #tpu.memory_space<vmem>>, vector<32x256xf32>,
    return
  }
  func.func @transform_0(%arg0: i32) -> (i32, i32) {
    %c0_i32 = arith.constant 0 : i32
    %c0_i32_0 = arith.constant 0 : i32
    return %arg0, %c0_i32 : i32, i32
  }
  func.func @transform_1(%arg0: i32) -> (i32, i32) {
    %c0_i32 = arith.constant 0 : i32
    %c0_i32_0 = arith.constant 0 : i32
    %c0_i32_1 = arith.constant 0 : i32
    return %c0_i32, %c0_i32_0 : i32, i32
  }
  func.func @transform_2(%arg0: i32) -> (i32, i32) {
    %c0_i32 = arith.constant 0 : i32
    %c0_i32_0 = arith.constant 0 : i32
    %c0_i32_1 = arith.constant 0 : i32
    return %c0_i32, %c0_i32_0 : i32, i32
  }
  func.func @transform_3(%arg0: i32) -> (i32, i32) {
    %c0_i32 = arith.constant 0 : i32
    %c0_i32_0 = arith.constant 0 : i32
    %c0_i32_1 = arith.constant 0 : i32
    return %c0_i32, %c0_i32_0 : i32, i32
  }
  func.func @transform_4(%arg0: i32) -> (i32, i32) {
    %c0_i32 = arith.constant 0 : i32
    %c0_i32_0 = arith.constant 0 : i32
    %c0_i32_1 = arith.constant 0 : i32
    return %c0_i32, %c0_i32_0 : i32, i32
  }
  func.func @transform_5(%arg0: i32) -> (i32, i32) {
    %c0_i32 = arith.constant 0 : i32
    %c0_i32_0 = arith.constant 0 : i32
    return %arg0, %c0_i32 : i32, i32
  }
}

module attributes {stable_mosaic.version = 11 : i64} {
  func.func @autoencoder_kernel(%arg0: i32, %arg1: memref<32x256xf32, #tpu.memory_space<vmem>>, %arg2: memref<256x128xf32, #tpu.memory_space<vmem>>, %arg3: memref<1x128xf32, #tpu.memory_space<vmem>>, %arg4: memref<128x256xf32, #tpu.memory_space<vmem>>, %arg5: memref<1x256xf32, #tpu.memory_space<vmem>>, %arg6: memref<32x256xf32, #tpu.memory_space<vmem>>) attributes {dimension_semantics = [#tpu.dimension_semantics<parallel>], iteration_bounds = array<i64: 3>, scalar_prefetch = 0 : i64, scratch_operands = 0 : i64, tpu.core_type = #tpu.core_type<tc>, window_params = [{transform_indices = @transform_0, window_bounds = array<i64: 32, 256>}, {pipeline_mode = #tpu.pipeline_mode<synchronous>, transform_indices = @transform_1, window_bounds = array<i64: 256, 128>}, {pipeline_mode = #tpu.pipeline_mode<synchronous>, transform_indices = @transform_2, window_bounds = array<i64: 1, 128>}, {pipeline_mode = #tpu.pipeline_mode<synchronous>, transform_indices = @transform_3, window_bounds = array<i64: 128, 256>}, {pipeline_mode = #tpu.pipeline_mode<synchronous>, transform_indices = @transform_4, window_bounds = array<i64: 1, 256>}, {transform_indices = @transform_5, window_bounds = array<i64: 32, 256>}]} {
    %c0 = arith.constant 0 : index
    %c0_0 = arith.constant 0 : index
    %0 = vector.load %arg1[%c0, %c0_0] : memref<32x256xf32, #tpu.memory_space<vmem>>, vector<32x256xf32>
    %c0_1 = arith.constant 0 : index
    %c0_2 = arith.constant 0 : index
    %1 = vector.load %arg2[%c0_1, %c0_2] : memref<256x128xf32, #tpu.memory_space<vmem>>, vector<256x128xf32>
    %cst = arith.constant dense<0.000000e+00> : vector<32x128xf32>
    %2 = tpu.matmul %0, %1, %cst {dimension_numbers = #tpu.dot_dimension_numbers<[1], [0], [0], [1], [0, 0, 1, 1], [], []>} : vector<32x256xf32>, vector<256x128xf32>, vector<32x128xf32> -> vector<32x128xf32>
    %c0_3 = arith.constant 0 : index
    %c0_4 = arith.constant 0 : index
    %3 = vector.load %arg3[%c0_3, %c0_4] : memref<1x128xf32, #tpu.memory_space<vmem>>, vector<1x128xf32>
    %4 = vector.broadcast %3 : vector<1x128xf32> to vector<32x128xf32>
    %5 = arith.addf %2, %4 : vector<32x128xf32>
    %cst_5 = arith.constant 5.000000e-01 : f32
    %6 = vector.broadcast %cst_5 : f32 to vector<32x128xf32>
    %7 = arith.mulf %6, %5 : vector<32x128xf32>
    %8 = math.tanh %7 : vector<32x128xf32>
    %cst_6 = arith.constant 5.000000e-01 : f32
    %9 = vector.broadcast %cst_6 : f32 to vector<32x128xf32>
    %10 = arith.mulf %9, %8 : vector<32x128xf32>
    %cst_7 = arith.constant 5.000000e-01 : f32
    %11 = vector.broadcast %cst_7 : f32 to vector<32x128xf32>
    %12 = arith.addf %10, %11 : vector<32x128xf32>
    %c0_8 = arith.constant 0 : index
    %c0_9 = arith.constant 0 : index
    %13 = vector.load %arg4[%c0_8, %c0_9] : memref<128x256xf32, #tpu.memory_space<vmem>>, vector<128x256xf32>
    %cst_10 = arith.constant dense<0.000000e+00> : vector<32x256xf32>
    %14 = tpu.matmul %12, %13, %cst_10 {dimension_numbers = #tpu.dot_dimension_numbers<[1], [0], [0], [1], [0, 0, 1, 1], [], []>} : vector<32x128xf32>, vector<128x256xf32>, vector<32x256xf32> -> vector<32x256xf32>
    %c0_11 = arith.constant 0 : index
    %c0_12 = arith.constant 0 : index
    %15 = vector.load %arg5[%c0_11, %c0_12] : memref<1x256xf32, #tpu.memory_space<vmem>>, vector<1x256xf32>
    %16 = vector.broadcast %15 : vector<1x256xf32> to vector<32x256xf32>
    %17 = arith.addf %14, %16 : vector<32x256xf32>
    %cst_13 = arith.constant 5.000000e-01 : f32
    %18 = vector.broadcast %cst_13 : f32 to vector<32x256xf32>
    %19 = arith.mulf %18, %17 : vector<32x256xf32>
    %20 = math.tanh %19 : vector<32x256xf32>
    %cst_14 = arith.constant 5.000000e-01 : f32
    %21 = vector.broadcast %cst_14 : f32 to vector<32x256xf32>
    %22 = arith.mulf %21, %20 : vector<32x256xf32>
    %cst_15 = arith.constant 5.000000e-01 : f32
    %23 = vector.broadcast %cst_15 : f32 to vector<32x256xf32>
    %24 = arith.addf %22, %23 : vector<32x256xf32>
    %c0_16 = arith.constant 0 : index
    %c0_17 = arith.constant 0 : index
    %25 = vector.load %arg6[%c0_16, %c0_17] : memref<32x256xf32, #tpu.memory_space<vmem>>, vector<32x256xf32>
    tpu.vector_store %arg6[%c0_16, %c0_17], %24 {strides = array<i32>} : memref<32x256xf32, #tpu.memory_space<vmem>>, vector<32x256xf32>,
    return
  }
  func.func @transform_0(%arg0: i32) -> (i32, i32) {
    %c0_i32 = arith.constant 0 : i32
    %c0_i32_0 = arith.constant 0 : i32
    return %arg0, %c0_i32 : i32, i32
  }
  func.func @transform_1(%arg0: i32) -> (i32, i32) {
    %c0_i32 = arith.constant 0 : i32
    %c0_i32_0 = arith.constant 0 : i32
    %c0_i32_1 = arith.constant 0 : i32
    return %c0_i32, %c0_i32_0 : i32, i32
  }
  func.func @transform_2(%arg0: i32) -> (i32, i32) {
    %c0_i32 = arith.constant 0 : i32
    %c0_i32_0 = arith.constant 0 : i32
    %c0_i32_1 = arith.constant 0 : i32
    return %c0_i32, %c0_i32_0 : i32, i32
  }
  func.func @transform_3(%arg0: i32) -> (i32, i32) {
    %c0_i32 = arith.constant 0 : i32
    %c0_i32_0 = arith.constant 0 : i32
    %c0_i32_1 = arith.constant 0 : i32
    return %c0_i32, %c0_i32_0 : i32, i32
  }
  func.func @transform_4(%arg0: i32) -> (i32, i32) {
    %c0_i32 = arith.constant 0 : i32
    %c0_i32_0 = arith.constant 0 : i32
    %c0_i32_1 = arith.constant 0 : i32
    return %c0_i32, %c0_i32_0 : i32, i32
  }
  func.func @transform_5(%arg0: i32) -> (i32, i32) {
    %c0_i32 = arith.constant 0 : i32
    %c0_i32_0 = arith.constant 0 : i32
    return %arg0, %c0_i32 : i32, i32
  }
}

</mosaic_0001>

<bundles_post_ra>
// kernel: tpu_custom_call.1
= control target key start
LH: loop header
LB: loop body
LE: loop exit
PB: predicated region body
PF: predicated region fallthrough
CT: control target
= control target key end

     0   :  { %10 = vsyncpa [#allocation3], 0  ;;  %s1384_s0 = inlined_call_operand.hbm [shape: f32[96,256], index: 0, kind: input, shape index: {}]   ;;  %s1385_s1 = inlined_call_operand.hbm [shape: f32[256,128], index: 1, kind: input, shape index: {}]   ;;  %s1386_s2 = inlined_call_operand.vmem [shape: f32[1,128], index: 2, kind: input, shape index: {}]   ;;  %s1387_s3 = inlined_call_operand.hbm [shape: f32[128,256], index: 3, kind: input, shape index: {}]   ;;  %s1388_s4 = inlined_call_operand.vmem [shape: f32[1,256], index: 4, kind: input, shape index: {}]   ;;  %s1389_s5 = inlined_call_operand.hbm [shape: f32[96,256], index: 5, kind: output, shape index: {}]  }
   0x1   :  { %12 = vsyncpa [#allocation3 + $0x1], 0 }
   0x2   :  { %13 = vsyncpa [#allocation6], 0 }
   0x3   :  { %14 = vsyncpa [#allocation4], 0 }
   0x4   :  { %16 = vsyncpa [#allocation4 + $0x1], 0  ;;  %s1133_s18 = smov 0   ;;  %s1135_s19 = smov 0  }
   0x5   :  { %s1137_s20 = smov 0   ;;  %s1139_s21 = smov 0  }
   0x6 LB: > { %s1154_s22 = sadd.s32 4294967295, %s1090_s21   ;;  %s703_s23 = sadd.s32 4294967294, %s1090_s21   ;;  %s1090_s21 = sphi %s1139_s21, %s1408_s21   ;;  %s1086_s20 = sphi %s1137_s20, %s1407_s20   ;;  %s1082_s19 = sphi %s1135_s19, %s1406_s19   ;;  %s1078_s18 = sphi %s1133_s18, %s1405_s18  }
   0x7   : > { %p42_p0 = scmp.ne.s32.totalorder %s1082_s19, %s1078_s18  ;;  %p1390_p1 = scmp.eq.s32.totalorder %s1154_s22, 0 }
   0x8   : > { %p156_p3 = scmp.eq.s32.totalorder %s703_s23, 2  ;;  %p704_p5 = scmp.ge.s32.totalorder %s1090_s21, 1 }
   0x9   : > { %p1163_p4 = por %p1390_p1, %p42_p0  ;;  %p163_p7 = scmp.lt.s32.totalorder %s1090_s21, 4 }
   0xa   : > { %p1168_p6 = por %p156_p3, %p42_p0  ;;  %s1092_s27 = smov [#allocation5]  }
   0xb   : > { %s1393_s24 = scalar_select %p1163_p4, 1, 0 }
   0xc   : > { %s1394_s25 = scalar_select %p1168_p6, 1, 0 }
   0xd   : > { %p1173_p8 = pnand %p704_p5, %p163_p7  ;;  %s175_s28 = sshll.u32 %s1092_s27, 4  ;;  %s176_s28 = int_to_ptr.vmem [resolvable:$true] %s175_s28 }
   0xe   : > { %s1093_s30 = smov [#allocation7]   ;;  %s934_s9 = scalar_lea.hbm %s1385_s1, 4096 }
   0xf   : > { %s1395_s26 = scalar_select %p1173_p8, 1, 0 }
  0x10   : > { %p848_p9 = pneg %p1173_p8  ;;  %s191_s6 = sshll.u32 %s1093_s30, 4  ;;  %s1185_s6 = int_to_ptr.vmem [resolvable:$true] %s191_s6 }
  0x11   : > { %p935_p11 = scmp.ne.s32.totalorder %s1385_s1, %s934_s9  ;;  %p941_p3 = scmp.lt.u32.totalorder %s934_s9, %s1385_s1 }
  0x12   : > { %p1181_p10 = pnand %p848_p9, %p1390_p1 }
  0x14   : > { %p936_p12 = pneg %p1181_p10 }
  0x16   : > { %p937_p13 = pnand %p936_p12, %p935_p11 }
  0x18   : > { %p938_p0 = pneg %p937_p13 }
  0x1a   : > { %p943_p5 = pnand %p941_p3, %p938_p0 }
  0x1c   : > { %946 = shalt.err (!%p943_p5)
}
  0x1d   : > { %s947_s14 = scalar_lea.vmem %s176_s28, 4096  ;;  %p955_p2 = scmp.lt.s32.totalorder %s176_s28, %s176_s28 }
  0x1e   : > { %p948_p7 = scmp.ne.s32.totalorder %s176_s28, %s947_s14  ;;  %p956_p6 = scmp.lt.s32.totalorder %s947_s14, %s947_s14 }
  0x20   : > { %p950_p9 = pnand %p948_p7, %p936_p12  ;;  %p957_p4 = por %p956_p6, %p955_p2 }
  0x22   : > { %p951_p1 = pneg %p950_p9 }
  0x24   : > { %p958_p8 = pnand %p957_p4, %p951_p1 }
  0x26   : > { %961 = shalt.err (!%p958_p8)
}
  0x27   : > { %s1094_s15 = smov 128   ;;  %s1095_s16 = smov 8  }
  0x28   : > { %851 = dma.hbm_to_vmem [thread:$0]  (!%p1181_p10), %s1385_s1, 4096, %s176_s28, [#allocation6], %s1094_s15, %s1094_s15, %s1095_s16  }
  0x29   : > { %s962_s7 = scalar_lea.hbm %s1387_s3, 4096 }
  0x2a   : > { %p963_p11 = scmp.ne.s32.totalorder %s1387_s3, %s962_s7  ;;  %p969_p4 = scmp.lt.u32.totalorder %s962_s7, %s1387_s3 }
  0x2c   : > { %p965_p1 = pnand %p963_p11, %p936_p12 }
  0x2e   : > { %p966_p2 = pneg %p965_p1 }
  0x30   : > { %p971_p6 = pnand %p969_p4, %p966_p2 }
  0x32   : > { %974 = shalt.err (!%p971_p6)
}
  0x33   : > { %s975_s28 = scalar_lea.vmem %s1185_s6, 4096  ;;  %p983_p3 = scmp.lt.s32.totalorder %s1185_s6, %s1185_s6 }
  0x34   : > { %p976_p8 = scmp.ne.s32.totalorder %s1185_s6, %s975_s28  ;;  %p984_p5 = scmp.lt.s32.totalorder %s975_s28, %s975_s28 }
  0x36   : > { %p978_p13 = pnand %p976_p8, %p936_p12  ;;  %p985_p7 = por %p984_p5, %p983_p3 }
  0x38   : > { %p979_p0 = pneg %p978_p13 }
  0x3a   : > { %p986_p9 = pnand %p985_p7, %p979_p0 }
  0x3c   : > { %989 = shalt.err (!%p986_p9)
}
  0x3d   : > { %s1096_s12 = smov 256   ;;  %s1097_s13 = smov 16  }
  0x3e   : > { %854 = dma.hbm_to_vmem [thread:$0]  (!%p1181_p10), %s1387_s3, 4096, %s1185_s6, [#allocation6], %s1096_s12, %s1096_s12, %s1097_s13  }
  0x3f   : > { %s1238_s16 = sadd.s32 1, %s1090_s21   ;;  %s29_s23 = sadd.s32 1, %s1086_s20 }
  0x40   : > { %s26_s17 = ssub.s32 %s1090_s21, %s1238_s16  ;;  %p36_p11 = scmp.ne.s32.totalorder %s1086_s20, %s1082_s19 }
  0x41   : > { %p27_p12 = scmp.eq.s32.totalorder %s26_s17, 0  ;;  %p37_p1 = scmp.eq.s32.totalorder %s1090_s21, 0 }
  0x42   : > { %p1397_p4 = scmp.eq.s32.totalorder %s1154_s22, 2  ;;  %p865_p8 = scmp.lt.s32.totalorder %s1090_s21, 3 }
  0x43   : > { %s1247_s27 = scalar_select %p27_p12, %s1086_s20, %s29_s23  }
  0x44   : > { %p38_p2 = por %p37_p1, %p36_p11  ;;  %p1251_p6 = por %p1397_p4, %p36_p11 }
  0x45   : > { %s208_s30 = sand.u32 1, %s1086_s20   ;;  %s725_s6 = sshll.u32 %s1090_s21, 10 }
  0x46   : > { %s708_s7 = sshll.u32 %s208_s30, 6  ;;  %s1261_s10 = scalar_lea.hbm %s1384_s0, %s725_s6 }
  0x47   : > { %s212_s11 = scalar_lea.vmem [#allocation2], %s708_s7  ;;  %p1265_p10 = pnand %p865_p8, %p38_p2 }
  0x48   : > { %s220_s28 = sshll.u32 %s212_s11, 4  ;;  %s1269_s15 = scalar_lea.sflag [#allocation3], %s208_s30  ;;  %s1263_s28 = int_to_ptr.vmem [resolvable:$true] %s220_s28 }
  0x49   : > { %s990_s17 = scalar_lea.hbm %s1261_s10, 1024  ;;  %p992_p0 = pneg %p1265_p10 }
  0x4a   : > { %p991_p13 = scmp.ne.s32.totalorder %s1261_s10, %s990_s17  ;;  %s995_s6 = scalar_lea.hbm %s1384_s0, 3072 }
  0x4b   : > { %p996_p7 = scmp.lt.u32.totalorder %s1261_s10, %s1384_s0  ;;  %p997_p9 = scmp.lt.u32.totalorder %s995_s6, %s990_s17 }
  0x4c   : > { %p993_p3 = pnand %p992_p0, %p991_p13  ;;  %p999_p11 = scmp.lt.u32.totalorder %s990_s17, %s1261_s10 }
  0x4d   : > { %p998_p12 = por %p997_p9, %p996_p7 }
  0x4e   : > { %p994_p5 = pneg %p993_p3 }
  0x4f   : > { %p1000_p1 = por %p999_p11, %p998_p12 }
  0x51   : > { %p1001_p2 = pnand %p1000_p1, %p994_p5 }
  0x53   : > { %1004 = shalt.err (!%p1001_p2)
}
  0x54   : > { %s1005_s30 = scalar_lea.vmem %s1263_s28, 1024  ;;  %s1098_s11 = smov [#allocation2]  }
  0x55   : > { %p1006_p4 = scmp.ne.s32.totalorder %s1263_s28, %s1005_s30  ;;  %s1010_s23 = sshll.u32 %s1098_s11, 4  ;;  %s1011_s23 = int_to_ptr.vmem [resolvable:$false] %s1010_s23 }
  0x56   : > { %s1012_s7 = scalar_lea.vmem %s1011_s23, 2048  ;;  %p1013_p3 = scmp.lt.s32.totalorder %s1263_s28, %s1011_s23 }
  0x57   : > { %p1008_p8 = pnand %p1006_p4, %p992_p0  ;;  %p1014_p7 = scmp.lt.s32.totalorder %s1012_s7, %s1005_s30 }
  0x59   : > { %p1009_p13 = pneg %p1008_p8  ;;  %p1015_p9 = por %p1014_p7, %p1013_p3 }
  0x5b   : > { %p1016_p12 = pnand %p1015_p9, %p1009_p13 }
  0x5d   : > { %1019 = shalt.err (!%p1016_p12)
}
  0x5e   : > { %858 = dma.hbm_to_vmem [thread:$0]  (!%p1265_p10), %s1261_s10, 1024, %s1263_s28, %s1269_s15, %s1096_s12, %s1096_s12, %s1097_s13  }
  0x5f   : > { %p1400_p0 = scmp.ne.s32.totalorder %s1395_s26, 0 }
  0x60   : > { %s1303_s17 = sand.u32 (!%p1400_p0), 1, %s1082_s19   ;;  %p1401_p5 = scmp.ne.s32.totalorder (!%p1400_p0), %s1393_s24, 0 }
  0x61   : > { %232 = sbr.rel (%p1400_p0) target bundleno = 636 (0x27c), region = 40  ;;  %s713_s6 = sshll.u32 (!%p1400_p0), %s1303_s17, 6 }
  0x62   : > { %s235_s8 = scalar_lea.sflag (!%p1400_p0), [#allocation3], %s1303_s17  ;;  %s1309_s14 = scalar_lea.vmem (!%p1400_p0), [#allocation2], %s713_s6 }
  0x68   : > { %1065 = dma.done.wait (%p1401_p5), %s235_s8, 1024  }
  0x69   : > { %1067 = vsyncadd (%p1401_p5), %s235_s8, 4294966272  ;;  %p1402_p10 = scmp.eq.s32.totalorder %s1154_s22, 0 }
  0x6b   : > { %1069 = dma.done.wait (%p1402_p10), [#allocation6], 8192   ;;  %p1403_p11 = pmov %p1402_p10 }
  0x6c   : > { %v299_v0 = vld [vmem:[#allocation5 + $0x80] sm:$0xff]  ;;  %v300_v1 = vld [vmem:[#allocation5 + $0x88] sm:$0xff]  ;;  %v301_v5 = vld [vmem:[#allocation5 + $0x90] sm:$0xff]  ;;  %s272_s10 = scalar_lea.vmem [#allocation8], %s713_s6  ;;  %s727_s28 = sshll.u32 %s1154_s22, 10 }
  0x6d   : > { %1071 = vsyncadd (%p1403_p11), [#allocation6], 4294959104  ;;  %v283_v2 = vld [vmem:[#allocation5] sm:$0xff]  ;;  %v772_v3 = vpack.c.bf16 %v300_v1, %v299_v0  ;;  %v284_v4 = vld [vmem:[#allocation5 + $0x8] sm:$0xff]  ;;  %s611_s15 = sshll.u32 %s272_s10, 4  ;;  %s1339_s11 = scalar_lea.hbm %s1389_s5, %s727_s28  ;;  %s1341_s15 = int_to_ptr.vmem [resolvable:$true] %s611_s15 }
  0x6e   : > { %v302_v6 = vld [vmem:[#allocation5 + $0x98] sm:$0xff]  ;;  %v774_v7 = vpack.c.bf16 %v284_v4, %v283_v2  ;;  %v285_v9 = vld [vmem:[#allocation5 + $0x10] sm:$0xff]  ;;  %v303_v11 = vld [vmem:[#allocation5 + $0xa0] sm:$0xff]  ;;  %s597_s22 = scalar_lea.sflag [#allocation4], %s1303_s17  ;;  %s1020_s23 = scalar_lea.vmem %s1341_s15, 1024 }
  0x6f   : > { %v776_v8 = vpack.c.bf16 %v302_v6, %v301_v5  ;;  %v286_v10 = vld [vmem:[#allocation5 + $0x18] sm:$0xff]  ;;  %773 = vmatprep.subr.bf16.mxu0 %v772_v3  ;;  %v304_v12 = vld [vmem:[#allocation5 + $0xa8] sm:$0xff]  ;;  %v287_v15 = vld [vmem:[#allocation5 + $0x20] sm:$0xff]  ;;  %p1021_p1 = scmp.ne.s32.totalorder %s1341_s15, %s1020_s23  ;;  %s1100_s7 = smov [#allocation8]  }
  0x70   : > { %775 = vmatpush3.bf16.msra.mxu0 %v774_v7  ;;  %v778_v13 = vpack.c.bf16 %v286_v10, %v285_v9  ;;  %v780_v14 = vpack.c.bf16 %v304_v12, %v303_v11  ;;  %v288_v16 = vld [vmem:[#allocation5 + $0x28] sm:$0xff]  ;;  %v305_v17 = vld [vmem:[#allocation5 + $0xb0] sm:$0xff]  ;;  %v306_v18 = vld [vmem:[#allocation5 + $0xb8] sm:$0xff]  ;;  %s1024_s6 = sshll.u32 %s1100_s7, 4  ;;  %s1025_s6 = int_to_ptr.vmem [resolvable:$false] %s1024_s6 }
  0x71   : > { %777 = vmatprep.subr.bf16.mxu0 %v776_v8  ;;  %v782_v19 = vpack.c.bf16 %v288_v16, %v287_v15  ;;  %v784_v20 = vpack.c.bf16 %v306_v18, %v305_v17  ;;  %v289_v21 = vld [vmem:[#allocation5 + $0x30] sm:$0xff]  ;;  %v290_v22 = vld [vmem:[#allocation5 + $0x38] sm:$0xff]  ;;  %v307_v23 = vld [vmem:[#allocation5 + $0xc0] sm:$0xff]  ;;  %p1022_p2 = pnand %p1021_p1, %p1251_p6  ;;  %s1026_s8 = scalar_lea.vmem %s1025_s6, 2048 }
  0x72   : > { %v308_v24 = vld [vmem:[#allocation5 + $0xc8] sm:$0xff]  ;;  %v786_v26 = vpack.c.bf16 %v290_v22, %v289_v21  ;;  %v291_v27 = vld [vmem:[#allocation5 + $0x40] sm:$0xff]  ;;  %v309_v29 = vld [vmem:[#allocation5 + $0xd0] sm:$0xff]  ;;  %p1027_p8 = scmp.lt.s32.totalorder %s1341_s15, %s1025_s6  ;;  %p1028_p13 = scmp.lt.s32.totalorder %s1026_s8, %s1020_s23 }
  0x73   : > { %v276_v25 = vld [vmem:[%s1309_s14 + $0x8] sm:$0xff]  ;;  %v788_v30 = vpack.c.bf16 %v308_v24, %v307_v23  ;;  %v310_v31 = vld [vmem:[#allocation5 + $0xd8] sm:$0xff]  ;;  %v423_v35 = vld [vmem:[#allocation7] sm:$0xff]  ;;  %p1023_p4 = pneg %p1022_p2 }
  0x74   : > { %779 = vmatpush3.bf16.msra.mxu0 %v778_v13  ;;  %386 = vmatprep.mubr.f32.mxu0 %v276_v25  ;;  %v292_v28 = vld [vmem:[#allocation5 + $0x48] sm:$0xff]  ;;  %v426_v33 = vld [vmem:[#allocation7 + $0x18] sm:$0xff]  ;;  %v425_v36 = vld [vmem:[#allocation7 + $0x10] sm:$0xff]  ;;  %v792_v46 = vpack.c.bf16 %v310_v31, %v309_v29  ;;  %p1029_p3 = por %p1028_p13, %p1027_p8 }
  0x75   : > { %781 = vmatprep.subr.bf16.mxu0 %v780_v14  ;;  %v424_v32 = vld [vmem:[#allocation7 + $0x8] sm:$0xff]  ;;  %v806_v38 = vpack.c.bf16 %v425_v36, %v423_v35  ;;  %v430_v39 = vld [vmem:[#allocation7 + $0x38] sm:$0xff]  ;;  %v427_v40 = vld [vmem:[#allocation7 + $0x20] sm:$0xff]  ;;  %v790_v42 = vpack.c.bf16 %v292_v28, %v291_v27 }
  0x76   : > { %v804_v34 = vpack.c.bf16 %v426_v33, %v424_v32  ;;  %v428_v37 = vld [vmem:[#allocation7 + $0x28] sm:$0xff]  ;;  %v429_v41 = vld [vmem:[#allocation7 + $0x30] sm:$0xff]  ;;  %v434_v45 = vld [vmem:[#allocation7 + $0x58] sm:$0xff]  ;;  %p1030_p7 = pnand %p1029_p3, %p1023_p4 }
  0x77   : > { %v808_v43 = vpack.c.bf16 %v430_v39, %v428_v37  ;;  %v432_v44 = vld [vmem:[#allocation7 + $0x48] sm:$0xff]  ;;  %v293_v47 = vld [vmem:[#allocation5 + $0x50] sm:$0xff]  ;;  %v294_v48 = vld [vmem:[#allocation5 + $0x58] sm:$0xff]  ;;  %v810_v49 = vpack.c.bf16 %v429_v41, %v427_v40  ;;  %v1099_v40 = vmov 0.0  }
  0x78   : > { %783 = vmatpush3.bf16.msra.mxu0 %v782_v19  ;;  %805 = vmatprep.subr.bf16.mxu1 %v804_v34  ;;  %v311_v50 = vld [vmem:[#allocation5 + $0xe0] sm:$0xff]  ;;  %v312_v51 = vld [vmem:[#allocation5 + $0xe8] sm:$0xff]  ;;  %v812_v52 = vpack.c.bf16 %v434_v45, %v432_v44  ;;  %v794_v53 = vpack.c.bf16 %v294_v48, %v293_v47  ;;  %v313_v57 = vld [vmem:[#allocation5 + $0xf0] sm:$0xff] }
  0x79   : > { %785 = vmatprep.subr.bf16.mxu0 %v784_v20  ;;  %807 = vmatpush1.bf16.msra.mxu1 %v806_v38  ;;  %v796_v54 = vpack.c.bf16 %v312_v51, %v311_v50  ;;  %v295_v55 = vld [vmem:[#allocation5 + $0x60] sm:$0xff]  ;;  %v296_v56 = vld [vmem:[#allocation5 + $0x68] sm:$0xff]  ;;  %v314_v58 = vld [vmem:[#allocation5 + $0xf8] sm:$0xff] }
  0x7a   : > { %809 = vmatprep.subr.bf16.mxu1 %v808_v43  ;;  %v798_v59 = vpack.c.bf16 %v296_v56, %v295_v55  ;;  %v800_v60 = vpack.c.bf16 %v314_v58, %v313_v57  ;;  %v297_v61 = vld [vmem:[#allocation5 + $0x70] sm:$0xff]  ;;  %v298_v62 = vld [vmem:[#allocation5 + $0x78] sm:$0xff]  ;;  %v275_v0 = vld [vmem:[%s1309_s14] sm:$0xff]  ;;  %531 = vmatprep.mubr.f32.mxu1 %v1099_v40 }
  0x7b   : > { %v802_v63 = vpack.c.bf16 %v298_v62, %v297_v61  ;;  %v278_v1 = vld [vmem:[%s1309_s14 + $0x18] sm:$0xff]  ;;  %v277_v2 = vld [vmem:[%s1309_s14 + $0x10] sm:$0xff]  ;;  %v280_v3 = vld [vmem:[%s1309_s14 + $0x28] sm:$0xff] }
  0x7c   : > { %787 = vmatpush3.bf16.msra.mxu0 %v786_v26  ;;  %v279_v4 = vld [vmem:[%s1309_s14 + $0x20] sm:$0xff]  ;;  %v282_v5 = vld [vmem:[%s1309_s14 + $0x38] sm:$0xff]  ;;  %v281_v6 = vld [vmem:[%s1309_s14 + $0x30] sm:$0xff] }
  0x7d   : > { %789 = vmatprep.subr.bf16.mxu0 %v788_v30  ;;  %811 = vmatpush1.bf16.msra.mxu1 %v810_v49  ;;  %v431_v7 = vld [vmem:[#allocation7 + $0x40] sm:$0xff]  ;;  %v433_v8 = vld [vmem:[#allocation7 + $0x50] sm:$0xff]  ;;  %v436_v10 = vld [vmem:[#allocation7 + $0x68] sm:$0xff] }
  0x7e   : > { %813 = vmatprep.subr.bf16.mxu1 %v812_v52  ;;  %v814_v9 = vpack.c.bf16 %v433_v8, %v431_v7  ;;  %v438_v11 = vld [vmem:[#allocation7 + $0x78] sm:$0xff]  ;;  %v435_v13 = vld [vmem:[#allocation7 + $0x60] sm:$0xff]  ;;  %v437_v14 = vld [vmem:[#allocation7 + $0x70] sm:$0xff] }
  0x7f   : > { %v816_v12 = vpack.c.bf16 %v438_v11, %v436_v10  ;;  %v818_v15 = vpack.c.bf16 %v437_v14, %v435_v13  ;;  %v440_v16 = vld [vmem:[#allocation7 + $0x88] sm:$0xff]  ;;  %v442_v17 = vld [vmem:[#allocation7 + $0x98] sm:$0xff]  ;;  %v439_v19 = vld [vmem:[#allocation7 + $0x80] sm:$0xff]  ;;  %v457_v10 = vlaneseq }
  0x80   : > { %791 = vmatpush3.bf16.msra.mxu0 %v790_v42  ;;  %v820_v18 = vpack.c.bf16 %v442_v17, %v440_v16  ;;  %v441_v20 = vld [vmem:[#allocation7 + $0x90] sm:$0xff]  ;;  %v444_v22 = vld [vmem:[#allocation7 + $0xa8] sm:$0xff]  ;;  %v446_v23 = vld [vmem:[#allocation7 + $0xb8] sm:$0xff] }
  0x81   : > { %793 = vmatprep.subr.bf16.mxu0 %v792_v46  ;;  %815 = vmatpush1.bf16.msra.mxu1 %v814_v9  ;;  %v822_v21 = vpack.c.bf16 %v441_v20, %v439_v19  ;;  %v824_v24 = vpack.c.bf16 %v446_v23, %v444_v22  ;;  %v443_v25 = vld [vmem:[#allocation7 + $0xa0] sm:$0xff]  ;;  %v445_v26 = vld [vmem:[#allocation7 + $0xb0] sm:$0xff]  ;;  %v448_v28 = vld [vmem:[#allocation7 + $0xc8] sm:$0xff]  ;;  %v458_v11 = vshrl.u32 %v457_v10, 7 }
  0x82   : > { %817 = vmatprep.subr.bf16.mxu1 %v816_v12  ;;  %v826_v27 = vpack.c.bf16 %v445_v26, %v443_v25  ;;  %v450_v29 = vld [vmem:[#allocation7 + $0xd8] sm:$0xff]  ;;  %v447_v31 = vld [vmem:[#allocation7 + $0xc0] sm:$0xff]  ;;  %v449_v32 = vld [vmem:[#allocation7 + $0xd0] sm:$0xff] }
  0x83   : > { %v828_v30 = vpack.c.bf16 %v450_v29, %v448_v28  ;;  %v830_v33 = vpack.c.bf16 %v449_v32, %v447_v31  ;;  %v452_v34 = vld [vmem:[#allocation7 + $0xe8] sm:$0xff]  ;;  %v454_v35 = vld [vmem:[#allocation7 + $0xf8] sm:$0xff]  ;;  %v451_v37 = vld [vmem:[#allocation7 + $0xe0] sm:$0xff]  ;;  %v459_v12 = vsub.s32 0, %v458_v11  ;;  %v463_v14 = vsub.s32 1, %v458_v11 }
  0x84   : > { %795 = vmatpush3.bf16.msra.mxu0 %v794_v53  ;;  %v832_v36 = vpack.c.bf16 %v454_v35, %v452_v34  ;;  %v453_v38 = vld [vmem:[#allocation7 + $0xf0] sm:$0xff]  ;;  %v717_v42 = vld [vmem:[%s1386_s2] ss:$0 sm:$0xff] }
  0x85   : > { %797 = vmatprep.subr.bf16.mxu0 %v796_v54  ;;  %819 = vmatpush1.bf16.msra.mxu1 %v818_v15  ;;  %v834_v39 = vpack.c.bf16 %v453_v38, %v451_v37  ;;  %v455_v13 = vld [vmem:[%s1388_s4] sm:$0x3] }
  0x86   : > { %821 = vmatprep.subr.bf16.mxu1 %v820_v18  ;;  %v460_v15 = vrot.slane %v455_v13, %v459_v12  ;;  %v464_v16 = vrot.slane %v455_v13, %v463_v14 }
  0x88   : > { %799 = vmatpush3.bf16.msra.mxu0 %v798_v59 }
  0x89   : > { %801 = vmatprep.subr.bf16.mxu0 %v800_v60  ;;  %823 = vmatpush1.bf16.msra.mxu1 %v822_v21 }
  0x8a   : > { %825 = vmatprep.subr.bf16.mxu1 %v824_v24 }
  0x8c   : > { %803 = vmatpush3.bf16.msra.mxu0 %v802_v63 }
  0x8d   : > { %827 = vmatpush1.bf16.msra.mxu1 %v826_v27 }
  0x8e   : > { %829 = vmatprep.subr.bf16.mxu1 %v828_v30 }
  0x8f   : > { %387 = vmatmul.mubr.f32.vlgmr.msra.gmra.mrb[0].mxu0 %v275_v0 }
  0x90   : > { %391 = vmatprep.mubr.f32.mxu0 %v278_v1 }
  0x91   : > { %831 = vmatpush1.bf16.msra.mxu1 %v830_v33 }
  0x92   : > { %833 = vmatprep.subr.bf16.mxu1 %v832_v36 }
  0x93   : > { %392 = vmatmul.mubr.f32.gmra.mrb[2].mxu0 %v277_v2 }
  0x94   : > { %396 = vmatprep.mubr.f32.mxu0 %v280_v3 }
  0x95   : > { %835 = vmatpush1.bf16.msra.mxu1 %v834_v39 }
  0x97   : > { %397 = vmatmul.mubr.f32.gmra.mrb[4].mxu0 %v279_v4 }
  0x98   : > { %401 = vmatprep.mubr.f32.mxu0 %v282_v5 }
  0x9b   : > { %402 = vmatmul.mubr.f32.gmra.mrb[6].mxu0 %v281_v6 }
 0x162   : > { %v760_v41 = vpop.f32.mrb[0].mxu0 }
 0x163   : > { %v761_v43 = vpop.f32.mrb[1].mxu0 }
 0x164   : > { %v762_v44 = vadd.f32 %v761_v43, %v760_v41 }
 0x166   : > { %v389_v45 = vadd.f32 %v762_v44, %v717_v42  ;;  %v763_v46 = vpop.f32.mrb[2].mxu0 }
 0x167   : > { %v764_v47 = vpop.f32.mrb[3].mxu0 }
 0x168   : > { %v407_v48 = vmul.f32 0.5, %v389_v45  ;;  %v765_v49 = vadd.f32 %v764_v47, %v763_v46 }
 0x16a   : > { %910 = vtanh.f32 %v407_v48  ;;  %v394_v50 = vadd.f32 %v765_v49, %v717_v42  ;;  %v766_v51 = vpop.f32.mrb[4].mxu0 }
 0x16b   : > { %v767_v52 = vpop.f32.mrb[5].mxu0 }
 0x16c   : > { %v408_v53 = vmul.f32 0.5, %v394_v50  ;;  %v768_v54 = vadd.f32 %v767_v52, %v766_v51 }
 0x16e   : > { %912 = vtanh.f32 %v408_v53  ;;  %v399_v55 = vadd.f32 %v768_v54, %v717_v42  ;;  %v769_v56 = vpop.f32.mrb[6].mxu0 }
 0x16f   : > { %v770_v57 = vpop.f32.mrb[7].mxu0 }
 0x170   : > { %v409_v58 = vmul.f32 0.5, %v399_v55  ;;  %v771_v59 = vadd.f32 %v770_v57, %v769_v56 }
 0x172   : > { %914 = vtanh.f32 %v409_v58  ;;  %v404_v60 = vadd.f32 %v771_v59, %v717_v42 }
 0x174   : > { %v911_v61 = vpop.eup %910  ;;  %v410_v62 = vmul.f32 0.5, %v404_v60 }
 0x175   : > { %v415_v63 = vmul.f32 0.5, %v911_v61 }
 0x176   : > { %916 = vtanh.f32 %v410_v62 }
 0x177   : > { %v419_v0 = vadd.f32 0.5, %v415_v63 }
 0x178   : > { %v913_v1 = vpop.eup %912 }
 0x179   : > { %532 = vmatmul.mubr.f32.vlgmr.msra.gmra.mrb[0].mxu1 %v419_v0  ;;  %v416_v2 = vmul.f32 0.5, %v913_v1 }
 0x17a   : > { %537 = vmatprep.mubr.f32.mxu1 %v1099_v40 }
 0x17b   : > { %v420_v3 = vadd.f32 0.5, %v416_v2 }
 0x17c   : > { %v915_v4 = vpop.eup %914 }
 0x17d   : > { %538 = vmatmul.mubr.f32.gmra.mrb[2].mxu1 %v420_v3  ;;  %v417_v5 = vmul.f32 0.5, %v915_v4 }
 0x17e   : > { %543 = vmatprep.mubr.f32.mxu1 %v1099_v40 }
 0x17f   : > { %v421_v6 = vadd.f32 0.5, %v417_v5 }
 0x180   : > { %v917_v7 = vpop.eup %916 }
 0x181   : > { %544 = vmatmul.mubr.f32.gmra.mrb[4].mxu1 %v421_v6  ;;  %v418_v8 = vmul.f32 0.5, %v917_v7 }
 0x182   : > { %549 = vmatprep.mubr.f32.mxu1 %v1099_v40 }
 0x183   : > { %v422_v9 = vadd.f32 0.5, %v418_v8 }
 0x185   : > { %550 = vmatmul.mubr.f32.gmra.mrb[6].mxu1 %v422_v9 }
 0x24c   : > { %v533_v17 = vpop.f32.mrb[0].mxu1 }
 0x24d   : > { %v534_v18 = vadd.f32 %v533_v17, %v460_v15  ;;  %v535_v19 = vpop.f32.mrb[1].mxu1 }
 0x24e   : > { %v536_v20 = vadd.f32 %v535_v19, %v464_v16 }
 0x24f   : > { %v556_v21 = vmul.f32 0.5, %v534_v18 }
 0x250   : > { %v557_v22 = vmul.f32 0.5, %v536_v20  ;;  %v539_v23 = vpop.f32.mrb[2].mxu1 }
 0x251   : > { %918 = vtanh.f32 %v556_v21  ;;  %v540_v24 = vadd.f32 %v539_v23, %v460_v15  ;;  %v541_v25 = vpop.f32.mrb[3].mxu1 }
 0x252   : > { %920 = vtanh.f32 %v557_v22  ;;  %v542_v26 = vadd.f32 %v541_v25, %v464_v16 }
 0x253   : > { %v558_v27 = vmul.f32 0.5, %v540_v24 }
 0x254   : > { %v559_v28 = vmul.f32 0.5, %v542_v26  ;;  %v545_v29 = vpop.f32.mrb[4].mxu1 }
 0x255   : > { %922 = vtanh.f32 %v558_v27  ;;  %v546_v30 = vadd.f32 %v545_v29, %v460_v15  ;;  %v547_v31 = vpop.f32.mrb[5].mxu1 }
 0x256   : > { %924 = vtanh.f32 %v559_v28  ;;  %v548_v32 = vadd.f32 %v547_v31, %v464_v16 }
 0x257   : > { %v560_v33 = vmul.f32 0.5, %v546_v30 }
 0x258   : > { %v561_v34 = vmul.f32 0.5, %v548_v32  ;;  %v551_v35 = vpop.f32.mrb[6].mxu1 }
 0x259   : > { %926 = vtanh.f32 %v560_v33  ;;  %v552_v36 = vadd.f32 %v551_v35, %v460_v15  ;;  %v553_v37 = vpop.f32.mrb[7].mxu1 }
 0x25a   : > { %928 = vtanh.f32 %v561_v34  ;;  %v554_v38 = vadd.f32 %v553_v37, %v464_v16 }
 0x25b   : > { %v919_v39 = vpop.eup %918  ;;  %v562_v40 = vmul.f32 0.5, %v552_v36 }
 0x25c   : > { %v921_v41 = vpop.eup %920  ;;  %v572_v42 = vmul.f32 0.5, %v919_v39  ;;  %v563_v43 = vmul.f32 0.5, %v554_v38 }
 0x25d   : > { %v573_v44 = vmul.f32 0.5, %v921_v41  ;;  %930 = vtanh.f32 %v562_v40 }
 0x25e   : > { %v580_v45 = vadd.f32 0.5, %v572_v42  ;;  %932 = vtanh.f32 %v563_v43 }
 0x25f   : > { %v923_v46 = vpop.eup %922  ;;  %v581_v47 = vadd.f32 0.5, %v573_v44 }
 0x260   : > { %v925_v48 = vpop.eup %924  ;;  %588 = vst [vmem:[%s272_s10] sm:$0xff] %v580_v45  ;;  %v574_v49 = vmul.f32 0.5, %v923_v46 }
 0x261   : > { %589 = vst [vmem:[%s272_s10 + $0x8] sm:$0xff] %v581_v47  ;;  %v575_v50 = vmul.f32 0.5, %v925_v48 }
 0x262   : > { %v582_v51 = vadd.f32 0.5, %v574_v49 }
 0x263   : > { %v927_v52 = vpop.eup %926  ;;  %v583_v53 = vadd.f32 0.5, %v575_v50 }
 0x264   : > { %v929_v54 = vpop.eup %928  ;;  %590 = vst [vmem:[%s272_s10 + $0x10] sm:$0xff] %v582_v51  ;;  %v576_v55 = vmul.f32 0.5, %v927_v52 }
 0x265   : > { %591 = vst [vmem:[%s272_s10 + $0x18] sm:$0xff] %v583_v53  ;;  %v577_v56 = vmul.f32 0.5, %v929_v54 }
 0x266   : > { %v584_v57 = vadd.f32 0.5, %v576_v55 }
 0x267   : > { %v931_v58 = vpop.eup %930  ;;  %v585_v59 = vadd.f32 0.5, %v577_v56 }
 0x268   : > { %v933_v60 = vpop.eup %932  ;;  %592 = vst [vmem:[%s272_s10 + $0x20] sm:$0xff] %v584_v57  ;;  %v578_v61 = vmul.f32 0.5, %v931_v58 }
 0x269   : > { %593 = vst [vmem:[%s272_s10 + $0x28] sm:$0xff] %v585_v59  ;;  %v579_v62 = vmul.f32 0.5, %v933_v60 }
 0x26a   : > { %v586_v63 = vadd.f32 0.5, %v578_v61 }
 0x26b   : > { %v587_v0 = vadd.f32 0.5, %v579_v62 }
 0x26c   : > { %594 = vst [vmem:[%s272_s10 + $0x30] sm:$0xff] %v586_v63 }
 0x26d   : > { %595 = vst [vmem:[%s272_s10 + $0x38] sm:$0xff] %v587_v0 }
 0x26e   : > { %1033 = shalt.err (!%p1030_p7)
}
 0x26f   : > { %s1034_s14 = scalar_lea.hbm %s1339_s11, 1024  ;;  %s1038_s12 = scalar_lea.hbm %s1389_s5, 3072 }
 0x270   : > { %p1035_p9 = scmp.ne.s32.totalorder %s1339_s11, %s1034_s14  ;;  %p1039_p5 = scmp.lt.u32.totalorder %s1339_s11, %s1389_s5 }
 0x271   : > { %p1040_p10 = scmp.lt.u32.totalorder %s1038_s12, %s1034_s14  ;;  %p1042_p1 = scmp.lt.u32.totalorder %s1034_s14, %s1339_s11 }
 0x272   : > { %p1036_p12 = pnand %p1035_p9, %p1251_p6 }
 0x273   : > { %p1041_p11 = por %p1040_p10, %p1039_p5 }
 0x274   : > { %p1037_p0 = pneg %p1036_p12 }
 0x275   : > { %p1043_p2 = por %p1042_p1, %p1041_p11 }
 0x277   : > { %p1044_p4 = pnand %p1043_p2, %p1037_p0 }
 0x279   : > { %1047 = shalt.err (!%p1044_p4)
}
 0x27a   : > { %s1101_s28 = smov 256   ;;  %s1102_s9 = smov 16  }
 0x27b   : > { %846 = dma.vmem_to_hbm [thread:$0]  (%p1251_p6), %s1341_s15, 1024, %s1339_s11, %s597_s22, %s1101_s28, %s1101_s28, %s1102_s9  }
 0x27c PF: > { %p868_p8 = scmp.ge.s32.totalorder %s1090_s21, 2  ;;  %s626_s30 = sand.u32 1, %s1078_s18  }
 0x27d   : > { %p1404_p13 = scmp.ne.s32.totalorder %s1394_s25, 0  ;;  %s627_s23 = scalar_lea.sflag [#allocation4], %s626_s30 }
 0x27f   : > { %p860_p3 = pnand %p868_p8, %p1404_p13 }
 0x281   : > { %1073 = dma.done.wait (!%p860_p3), %s627_s23, 1024  }
 0x282   : > { %1075 = vsyncadd (!%p860_p3), %s627_s23, 4294966272  ;;  %p19_p7 = scmp.ge.s32.totalorder %s1238_s16, 5   ;;  %s1405_s18 = smov %s1082_s19 }
 0x283   : > { %s1406_s19 = smov %s1086_s20  ;;  %s1407_s20 = smov %s1247_s27 }
 0x284   : > { %s1408_s21 = smov %s1238_s16  ;;  %21 = sbr.rel (!%p19_p7) target bundleno = 6 (0x6), region = 93 }
 0x28b   :  { %632 = vsyncpa [#allocation3], 1 }
 0x28c   :  { %634 = vsyncpa [#allocation3 + $0x1], 1 }
 0x28d   :  { %635 = vsyncpa [#allocation6], 1 }
 0x28e   :  { %636 = vsyncpa [#allocation4], 1 }
 0x28f   :  { %638 = vsyncpa [#allocation4 + $0x1], 1 }

// kernel: tpu_custom_call.1
= control target key start
LH: loop header
LB: loop body
LE: loop exit
PB: predicated region body
PF: predicated region fallthrough
CT: control target
= control target key end

     0   :  { %10 = vsyncpa [#allocation3], 0  ;;  %s1384_s0 = inlined_call_operand.hbm [shape: f32[96,256], index: 0, kind: input, shape index: {}]   ;;  %s1385_s1 = inlined_call_operand.hbm [shape: f32[256,128], index: 1, kind: input, shape index: {}]   ;;  %s1386_s2 = inlined_call_operand.vmem [shape: f32[1,128], index: 2, kind: input, shape index: {}]   ;;  %s1387_s3 = inlined_call_operand.hbm [shape: f32[128,256], index: 3, kind: input, shape index: {}]   ;;  %s1388_s4 = inlined_call_operand.vmem [shape: f32[1,256], index: 4, kind: input, shape index: {}]   ;;  %s1389_s5 = inlined_call_operand.hbm [shape: f32[96,256], index: 5, kind: output, shape index: {}]  }
   0x1   :  { %12 = vsyncpa [#allocation3 + $0x1], 0 }
   0x2   :  { %13 = vsyncpa [#allocation6], 0 }
   0x3   :  { %14 = vsyncpa [#allocation4], 0 }
   0x4   :  { %16 = vsyncpa [#allocation4 + $0x1], 0  ;;  %s1133_s18 = smov 0   ;;  %s1135_s19 = smov 0  }
   0x5   :  { %s1137_s20 = smov 0   ;;  %s1139_s21 = smov 0  }
   0x6 LB: > { %s1154_s22 = sadd.s32 4294967295, %s1090_s21   ;;  %s703_s23 = sadd.s32 4294967294, %s1090_s21   ;;  %s1090_s21 = sphi %s1139_s21, %s1408_s21   ;;  %s1086_s20 = sphi %s1137_s20, %s1407_s20   ;;  %s1082_s19 = sphi %s1135_s19, %s1406_s19   ;;  %s1078_s18 = sphi %s1133_s18, %s1405_s18  }
   0x7   : > { %p42_p0 = scmp.ne.s32.totalorder %s1082_s19, %s1078_s18  ;;  %p1390_p1 = scmp.eq.s32.totalorder %s1154_s22, 0 }
   0x8   : > { %p156_p3 = scmp.eq.s32.totalorder %s703_s23, 2  ;;  %p704_p5 = scmp.ge.s32.totalorder %s1090_s21, 1 }
   0x9   : > { %p1163_p4 = por %p1390_p1, %p42_p0  ;;  %p163_p7 = scmp.lt.s32.totalorder %s1090_s21, 4 }
   0xa   : > { %p1168_p6 = por %p156_p3, %p42_p0  ;;  %s1092_s27 = smov [#allocation5]  }
   0xb   : > { %s1393_s24 = scalar_select %p1163_p4, 1, 0 }
   0xc   : > { %s1394_s25 = scalar_select %p1168_p6, 1, 0 }
   0xd   : > { %p1173_p8 = pnand %p704_p5, %p163_p7  ;;  %s175_s28 = sshll.u32 %s1092_s27, 4  ;;  %s176_s28 = int_to_ptr.vmem [resolvable:$true] %s175_s28 }
   0xe   : > { %s1093_s30 = smov [#allocation7]   ;;  %s934_s9 = scalar_lea.hbm %s1385_s1, 4096 }
   0xf   : > { %s1395_s26 = scalar_select %p1173_p8, 1, 0 }
  0x10   : > { %p848_p9 = pneg %p1173_p8  ;;  %s191_s6 = sshll.u32 %s1093_s30, 4  ;;  %s1185_s6 = int_to_ptr.vmem [resolvable:$true] %s191_s6 }
  0x11   : > { %p935_p11 = scmp.ne.s32.totalorder %s1385_s1, %s934_s9  ;;  %p941_p3 = scmp.lt.u32.totalorder %s934_s9, %s1385_s1 }
  0x12   : > { %p1181_p10 = pnand %p848_p9, %p1390_p1 }
  0x14   : > { %p936_p12 = pneg %p1181_p10 }
  0x16   : > { %p937_p13 = pnand %p936_p12, %p935_p11 }
  0x18   : > { %p938_p0 = pneg %p937_p13 }
  0x1a   : > { %p943_p5 = pnand %p941_p3, %p938_p0 }
  0x1c   : > { %946 = shalt.err (!%p943_p5)
}
  0x1d   : > { %s947_s14 = scalar_lea.vmem %s176_s28, 4096  ;;  %p955_p2 = scmp.lt.s32.totalorder %s176_s28, %s176_s28 }
  0x1e   : > { %p948_p7 = scmp.ne.s32.totalorder %s176_s28, %s947_s14  ;;  %p956_p6 = scmp.lt.s32.totalorder %s947_s14, %s947_s14 }
  0x20   : > { %p950_p9 = pnand %p948_p7, %p936_p12  ;;  %p957_p4 = por %p956_p6, %p955_p2 }
  0x22   : > { %p951_p1 = pneg %p950_p9 }
  0x24   : > { %p958_p8 = pnand %p957_p4, %p951_p1 }
  0x26   : > { %961 = shalt.err (!%p958_p8)
}
  0x27   : > { %s1094_s15 = smov 128   ;;  %s1095_s16 = smov 8  }
  0x28   : > { %851 = dma.hbm_to_vmem [thread:$0]  (!%p1181_p10), %s1385_s1, 4096, %s176_s28, [#allocation6], %s1094_s15, %s1094_s15, %s1095_s16  }
  0x29   : > { %s962_s7 = scalar_lea.hbm %s1387_s3, 4096 }
  0x2a   : > { %p963_p11 = scmp.ne.s32.totalorder %s1387_s3, %s962_s7  ;;  %p969_p4 = scmp.lt.u32.totalorder %s962_s7, %s1387_s3 }
  0x2c   : > { %p965_p1 = pnand %p963_p11, %p936_p12 }
  0x2e   : > { %p966_p2 = pneg %p965_p1 }
  0x30   : > { %p971_p6 = pnand %p969_p4, %p966_p2 }
  0x32   : > { %974 = shalt.err (!%p971_p6)
}
  0x33   : > { %s975_s28 = scalar_lea.vmem %s1185_s6, 4096  ;;  %p983_p3 = scmp.lt.s32.totalorder %s1185_s6, %s1185_s6 }
  0x34   : > { %p976_p8 = scmp.ne.s32.totalorder %s1185_s6, %s975_s28  ;;  %p984_p5 = scmp.lt.s32.totalorder %s975_s28, %s975_s28 }
  0x36   : > { %p978_p13 = pnand %p976_p8, %p936_p12  ;;  %p985_p7 = por %p984_p5, %p983_p3 }
  0x38   : > { %p979_p0 = pneg %p978_p13 }
  0x3a   : > { %p986_p9 = pnand %p985_p7, %p979_p0 }
  0x3c   : > { %989 = shalt.err (!%p986_p9)
}
  0x3d   : > { %s1096_s12 = smov 256   ;;  %s1097_s13 = smov 16  }
  0x3e   : > { %854 = dma.hbm_to_vmem [thread:$0]  (!%p1181_p10), %s1387_s3, 4096, %s1185_s6, [#allocation6], %s1096_s12, %s1096_s12, %s1097_s13  }
  0x3f   : > { %s1238_s16 = sadd.s32 1, %s1090_s21   ;;  %s29_s23 = sadd.s32 1, %s1086_s20 }
  0x40   : > { %s26_s17 = ssub.s32 %s1090_s21, %s1238_s16  ;;  %p36_p11 = scmp.ne.s32.totalorder %s1086_s20, %s1082_s19 }
  0x41   : > { %p27_p12 = scmp.eq.s32.totalorder %s26_s17, 0  ;;  %p37_p1 = scmp.eq.s32.totalorder %s1090_s21, 0 }
  0x42   : > { %p1397_p4 = scmp.eq.s32.totalorder %s1154_s22, 2  ;;  %p865_p8 = scmp.lt.s32.totalorder %s1090_s21, 3 }
  0x43   : > { %s1247_s27 = scalar_select %p27_p12, %s1086_s20, %s29_s23  }
  0x44   : > { %p38_p2 = por %p37_p1, %p36_p11  ;;  %p1251_p6 = por %p1397_p4, %p36_p11 }
  0x45   : > { %s208_s30 = sand.u32 1, %s1086_s20   ;;  %s725_s6 = sshll.u32 %s1090_s21, 10 }
  0x46   : > { %s708_s7 = sshll.u32 %s208_s30, 6  ;;  %s1261_s10 = scalar_lea.hbm %s1384_s0, %s725_s6 }
  0x47   : > { %s212_s11 = scalar_lea.vmem [#allocation2], %s708_s7  ;;  %p1265_p10 = pnand %p865_p8, %p38_p2 }
  0x48   : > { %s220_s28 = sshll.u32 %s212_s11, 4  ;;  %s1269_s15 = scalar_lea.sflag [#allocation3], %s208_s30  ;;  %s1263_s28 = int_to_ptr.vmem [resolvable:$true] %s220_s28 }
  0x49   : > { %s990_s17 = scalar_lea.hbm %s1261_s10, 1024  ;;  %p992_p0 = pneg %p1265_p10 }
  0x4a   : > { %p991_p13 = scmp.ne.s32.totalorder %s1261_s10, %s990_s17  ;;  %s995_s6 = scalar_lea.hbm %s1384_s0, 3072 }
  0x4b   : > { %p996_p7 = scmp.lt.u32.totalorder %s1261_s10, %s1384_s0  ;;  %p997_p9 = scmp.lt.u32.totalorder %s995_s6, %s990_s17 }
  0x4c   : > { %p993_p3 = pnand %p992_p0, %p991_p13  ;;  %p999_p11 = scmp.lt.u32.totalorder %s990_s17, %s1261_s10 }
  0x4d   : > { %p998_p12 = por %p997_p9, %p996_p7 }
  0x4e   : > { %p994_p5 = pneg %p993_p3 }
  0x4f   : > { %p1000_p1 = por %p999_p11, %p998_p12 }
  0x51   : > { %p1001_p2 = pnand %p1000_p1, %p994_p5 }
  0x53   : > { %1004 = shalt.err (!%p1001_p2)
}
  0x54   : > { %s1005_s30 = scalar_lea.vmem %s1263_s28, 1024  ;;  %s1098_s11 = smov [#allocation2]  }
  0x55   : > { %p1006_p4 = scmp.ne.s32.totalorder %s1263_s28, %s1005_s30  ;;  %s1010_s23 = sshll.u32 %s1098_s11, 4  ;;  %s1011_s23 = int_to_ptr.vmem [resolvable:$false] %s1010_s23 }
  0x56   : > { %s1012_s7 = scalar_lea.vmem %s1011_s23, 2048  ;;  %p1013_p3 = scmp.lt.s32.totalorder %s1263_s28, %s1011_s23 }
  0x57   : > { %p1008_p8 = pnand %p1006_p4, %p992_p0  ;;  %p1014_p7 = scmp.lt.s32.totalorder %s1012_s7, %s1005_s30 }
  0x59   : > { %p1009_p13 = pneg %p1008_p8  ;;  %p1015_p9 = por %p1014_p7, %p1013_p3 }
  0x5b   : > { %p1016_p12 = pnand %p1015_p9, %p1009_p13 }
  0x5d   : > { %1019 = shalt.err (!%p1016_p12)
}
  0x5e   : > { %858 = dma.hbm_to_vmem [thread:$0]  (!%p1265_p10), %s1261_s10, 1024, %s1263_s28, %s1269_s15, %s1096_s12, %s1096_s12, %s1097_s13  }
  0x5f   : > { %p1400_p0 = scmp.ne.s32.totalorder %s1395_s26, 0 }
  0x60   : > { %s1303_s17 = sand.u32 (!%p1400_p0), 1, %s1082_s19   ;;  %p1401_p5 = scmp.ne.s32.totalorder (!%p1400_p0), %s1393_s24, 0 }
  0x61   : > { %232 = sbr.rel (%p1400_p0) target bundleno = 636 (0x27c), region = 40  ;;  %s713_s6 = sshll.u32 (!%p1400_p0), %s1303_s17, 6 }
  0x62   : > { %s235_s8 = scalar_lea.sflag (!%p1400_p0), [#allocation3], %s1303_s17  ;;  %s1309_s14 = scalar_lea.vmem (!%p1400_p0), [#allocation2], %s713_s6 }
  0x68   : > { %1065 = dma.done.wait (%p1401_p5), %s235_s8, 1024  }
  0x69   : > { %1067 = vsyncadd (%p1401_p5), %s235_s8, 4294966272  ;;  %p1402_p10 = scmp.eq.s32.totalorder %s1154_s22, 0 }
  0x6b   : > { %1069 = dma.done.wait (%p1402_p10), [#allocation6], 8192   ;;  %p1403_p11 = pmov %p1402_p10 }
  0x6c   : > { %v299_v0 = vld [vmem:[#allocation5 + $0x80] sm:$0xff]  ;;  %v300_v1 = vld [vmem:[#allocation5 + $0x88] sm:$0xff]  ;;  %v301_v5 = vld [vmem:[#allocation5 + $0x90] sm:$0xff]  ;;  %s272_s10 = scalar_lea.vmem [#allocation8], %s713_s6  ;;  %s727_s28 = sshll.u32 %s1154_s22, 10 }
  0x6d   : > { %1071 = vsyncadd (%p1403_p11), [#allocation6], 4294959104  ;;  %v283_v2 = vld [vmem:[#allocation5] sm:$0xff]  ;;  %v772_v3 = vpack.c.bf16 %v300_v1, %v299_v0  ;;  %v284_v4 = vld [vmem:[#allocation5 + $0x8] sm:$0xff]  ;;  %s611_s15 = sshll.u32 %s272_s10, 4  ;;  %s1339_s11 = scalar_lea.hbm %s1389_s5, %s727_s28  ;;  %s1341_s15 = int_to_ptr.vmem [resolvable:$true] %s611_s15 }
  0x6e   : > { %v302_v6 = vld [vmem:[#allocation5 + $0x98] sm:$0xff]  ;;  %v774_v7 = vpack.c.bf16 %v284_v4, %v283_v2  ;;  %v285_v9 = vld [vmem:[#allocation5 + $0x10] sm:$0xff]  ;;  %v303_v11 = vld [vmem:[#allocation5 + $0xa0] sm:$0xff]  ;;  %s597_s22 = scalar_lea.sflag [#allocation4], %s1303_s17  ;;  %s1020_s23 = scalar_lea.vmem %s1341_s15, 1024 }
  0x6f   : > { %v776_v8 = vpack.c.bf16 %v302_v6, %v301_v5  ;;  %v286_v10 = vld [vmem:[#allocation5 + $0x18] sm:$0xff]  ;;  %773 = vmatprep.subr.bf16.mxu0 %v772_v3  ;;  %v304_v12 = vld [vmem:[#allocation5 + $0xa8] sm:$0xff]  ;;  %v287_v15 = vld [vmem:[#allocation5 + $0x20] sm:$0xff]  ;;  %p1021_p1 = scmp.ne.s32.totalorder %s1341_s15, %s1020_s23  ;;  %s1100_s7 = smov [#allocation8]  }
  0x70   : > { %775 = vmatpush3.bf16.msra.mxu0 %v774_v7  ;;  %v778_v13 = vpack.c.bf16 %v286_v10, %v285_v9  ;;  %v780_v14 = vpack.c.bf16 %v304_v12, %v303_v11  ;;  %v288_v16 = vld [vmem:[#allocation5 + $0x28] sm:$0xff]  ;;  %v305_v17 = vld [vmem:[#allocation5 + $0xb0] sm:$0xff]  ;;  %v306_v18 = vld [vmem:[#allocation5 + $0xb8] sm:$0xff]  ;;  %s1024_s6 = sshll.u32 %s1100_s7, 4  ;;  %s1025_s6 = int_to_ptr.vmem [resolvable:$false] %s1024_s6 }
  0x71   : > { %777 = vmatprep.subr.bf16.mxu0 %v776_v8  ;;  %v782_v19 = vpack.c.bf16 %v288_v16, %v287_v15  ;;  %v784_v20 = vpack.c.bf16 %v306_v18, %v305_v17  ;;  %v289_v21 = vld [vmem:[#allocation5 + $0x30] sm:$0xff]  ;;  %v290_v22 = vld [vmem:[#allocation5 + $0x38] sm:$0xff]  ;;  %v307_v23 = vld [vmem:[#allocation5 + $0xc0] sm:$0xff]  ;;  %p1022_p2 = pnand %p1021_p1, %p1251_p6  ;;  %s1026_s8 = scalar_lea.vmem %s1025_s6, 2048 }
  0x72   : > { %v308_v24 = vld [vmem:[#allocation5 + $0xc8] sm:$0xff]  ;;  %v786_v26 = vpack.c.bf16 %v290_v22, %v289_v21  ;;  %v291_v27 = vld [vmem:[#allocation5 + $0x40] sm:$0xff]  ;;  %v309_v29 = vld [vmem:[#allocation5 + $0xd0] sm:$0xff]  ;;  %p1027_p8 = scmp.lt.s32.totalorder %s1341_s15, %s1025_s6  ;;  %p1028_p13 = scmp.lt.s32.totalorder %s1026_s8, %s1020_s23 }
  0x73   : > { %v276_v25 = vld [vmem:[%s1309_s14 + $0x8] sm:$0xff]  ;;  %v788_v30 = vpack.c.bf16 %v308_v24, %v307_v23  ;;  %v310_v31 = vld [vmem:[#allocation5 + $0xd8] sm:$0xff]  ;;  %v423_v35 = vld [vmem:[#allocation7] sm:$0xff]  ;;  %p1023_p4 = pneg %p1022_p2 }
  0x74   : > { %779 = vmatpush3.bf16.msra.mxu0 %v778_v13  ;;  %386 = vmatprep.mubr.f32.mxu0 %v276_v25  ;;  %v292_v28 = vld [vmem:[#allocation5 + $0x48] sm:$0xff]  ;;  %v426_v33 = vld [vmem:[#allocation7 + $0x18] sm:$0xff]  ;;  %v425_v36 = vld [vmem:[#allocation7 + $0x10] sm:$0xff]  ;;  %v792_v46 = vpack.c.bf16 %v310_v31, %v309_v29  ;;  %p1029_p3 = por %p1028_p13, %p1027_p8 }
  0x75   : > { %781 = vmatprep.subr.bf16.mxu0 %v780_v14  ;;  %v424_v32 = vld [vmem:[#allocation7 + $0x8] sm:$0xff]  ;;  %v806_v38 = vpack.c.bf16 %v425_v36, %v423_v35  ;;  %v430_v39 = vld [vmem:[#allocation7 + $0x38] sm:$0xff]  ;;  %v427_v40 = vld [vmem:[#allocation7 + $0x20] sm:$0xff]  ;;  %v790_v42 = vpack.c.bf16 %v292_v28, %v291_v27 }
  0x76   : > { %v804_v34 = vpack.c.bf16 %v426_v33, %v424_v32  ;;  %v428_v37 = vld [vmem:[#allocation7 + $0x28] sm:$0xff]  ;;  %v429_v41 = vld [vmem:[#allocation7 + $0x30] sm:$0xff]  ;;  %v434_v45 = vld [vmem:[#allocation7 + $0x58] sm:$0xff]  ;;  %p1030_p7 = pnand %p1029_p3, %p1023_p4 }
  0x77   : > { %v808_v43 = vpack.c.bf16 %v430_v39, %v428_v37  ;;  %v432_v44 = vld [vmem:[#allocation7 + $0x48] sm:$0xff]  ;;  %v293_v47 = vld [vmem:[#allocation5 + $0x50] sm:$0xff]  ;;  %v294_v48 = vld [vmem:[#allocation5 + $0x58] sm:$0xff]  ;;  %v810_v49 = vpack.c.bf16 %v429_v41, %v427_v40  ;;  %v1099_v40 = vmov 0.0  }
  0x78   : > { %783 = vmatpush3.bf16.msra.mxu0 %v782_v19  ;;  %805 = vmatprep.subr.bf16.mxu1 %v804_v34  ;;  %v311_v50 = vld [vmem:[#allocation5 + $0xe0] sm:$0xff]  ;;  %v312_v51 = vld [vmem:[#allocation5 + $0xe8] sm:$0xff]  ;;  %v812_v52 = vpack.c.bf16 %v434_v45, %v432_v44  ;;  %v794_v53 = vpack.c.bf16 %v294_v48, %v293_v47  ;;  %v313_v57 = vld [vmem:[#allocation5 + $0xf0] sm:$0xff] }
  0x79   : > { %785 = vmatprep.subr.bf16.mxu0 %v784_v20  ;;  %807 = vmatpush1.bf16.msra.mxu1 %v806_v38  ;;  %v796_v54 = vpack.c.bf16 %v312_v51, %v311_v50  ;;  %v295_v55 = vld [vmem:[#allocation5 + $0x60] sm:$0xff]  ;;  %v296_v56 = vld [vmem:[#allocation5 + $0x68] sm:$0xff]  ;;  %v314_v58 = vld [vmem:[#allocation5 + $0xf8] sm:$0xff] }
  0x7a   : > { %809 = vmatprep.subr.bf16.mxu1 %v808_v43  ;;  %v798_v59 = vpack.c.bf16 %v296_v56, %v295_v55  ;;  %v800_v60 = vpack.c.bf16 %v314_v58, %v313_v57  ;;  %v297_v61 = vld [vmem:[#allocation5 + $0x70] sm:$0xff]  ;;  %v298_v62 = vld [vmem:[#allocation5 + $0x78] sm:$0xff]  ;;  %v275_v0 = vld [vmem:[%s1309_s14] sm:$0xff]  ;;  %531 = vmatprep.mubr.f32.mxu1 %v1099_v40 }
  0x7b   : > { %v802_v63 = vpack.c.bf16 %v298_v62, %v297_v61  ;;  %v278_v1 = vld [vmem:[%s1309_s14 + $0x18] sm:$0xff]  ;;  %v277_v2 = vld [vmem:[%s1309_s14 + $0x10] sm:$0xff]  ;;  %v280_v3 = vld [vmem:[%s1309_s14 + $0x28] sm:$0xff] }
  0x7c   : > { %787 = vmatpush3.bf16.msra.mxu0 %v786_v26  ;;  %v279_v4 = vld [vmem:[%s1309_s14 + $0x20] sm:$0xff]  ;;  %v282_v5 = vld [vmem:[%s1309_s14 + $0x38] sm:$0xff]  ;;  %v281_v6 = vld [vmem:[%s1309_s14 + $0x30] sm:$0xff] }
  0x7d   : > { %789 = vmatprep.subr.bf16.mxu0 %v788_v30  ;;  %811 = vmatpush1.bf16.msra.mxu1 %v810_v49  ;;  %v431_v7 = vld [vmem:[#allocation7 + $0x40] sm:$0xff]  ;;  %v433_v8 = vld [vmem:[#allocation7 + $0x50] sm:$0xff]  ;;  %v436_v10 = vld [vmem:[#allocation7 + $0x68] sm:$0xff] }
  0x7e   : > { %813 = vmatprep.subr.bf16.mxu1 %v812_v52  ;;  %v814_v9 = vpack.c.bf16 %v433_v8, %v431_v7  ;;  %v438_v11 = vld [vmem:[#allocation7 + $0x78] sm:$0xff]  ;;  %v435_v13 = vld [vmem:[#allocation7 + $0x60] sm:$0xff]  ;;  %v437_v14 = vld [vmem:[#allocation7 + $0x70] sm:$0xff] }
  0x7f   : > { %v816_v12 = vpack.c.bf16 %v438_v11, %v436_v10  ;;  %v818_v15 = vpack.c.bf16 %v437_v14, %v435_v13  ;;  %v440_v16 = vld [vmem:[#allocation7 + $0x88] sm:$0xff]  ;;  %v442_v17 = vld [vmem:[#allocation7 + $0x98] sm:$0xff]  ;;  %v439_v19 = vld [vmem:[#allocation7 + $0x80] sm:$0xff]  ;;  %v457_v10 = vlaneseq }
  0x80   : > { %791 = vmatpush3.bf16.msra.mxu0 %v790_v42  ;;  %v820_v18 = vpack.c.bf16 %v442_v17, %v440_v16  ;;  %v441_v20 = vld [vmem:[#allocation7 + $0x90] sm:$0xff]  ;;  %v444_v22 = vld [vmem:[#allocation7 + $0xa8] sm:$0xff]  ;;  %v446_v23 = vld [vmem:[#allocation7 + $0xb8] sm:$0xff] }
  0x81   : > { %793 = vmatprep.subr.bf16.mxu0 %v792_v46  ;;  %815 = vmatpush1.bf16.msra.mxu1 %v814_v9  ;;  %v822_v21 = vpack.c.bf16 %v441_v20, %v439_v19  ;;  %v824_v24 = vpack.c.bf16 %v446_v23, %v444_v22  ;;  %v443_v25 = vld [vmem:[#allocation7 + $0xa0] sm:$0xff]  ;;  %v445_v26 = vld [vmem:[#allocation7 + $0xb0] sm:$0xff]  ;;  %v448_v28 = vld [vmem:[#allocation7 + $0xc8] sm:$0xff]  ;;  %v458_v11 = vshrl.u32 %v457_v10, 7 }
  0x82   : > { %817 = vmatprep.subr.bf16.mxu1 %v816_v12  ;;  %v826_v27 = vpack.c.bf16 %v445_v26, %v443_v25  ;;  %v450_v29 = vld [vmem:[#allocation7 + $0xd8] sm:$0xff]  ;;  %v447_v31 = vld [vmem:[#allocation7 + $0xc0] sm:$0xff]  ;;  %v449_v32 = vld [vmem:[#allocation7 + $0xd0] sm:$0xff] }
  0x83   : > { %v828_v30 = vpack.c.bf16 %v450_v29, %v448_v28  ;;  %v830_v33 = vpack.c.bf16 %v449_v32, %v447_v31  ;;  %v452_v34 = vld [vmem:[#allocation7 + $0xe8] sm:$0xff]  ;;  %v454_v35 = vld [vmem:[#allocation7 + $0xf8] sm:$0xff]  ;;  %v451_v37 = vld [vmem:[#allocation7 + $0xe0] sm:$0xff]  ;;  %v459_v12 = vsub.s32 0, %v458_v11  ;;  %v463_v14 = vsub.s32 1, %v458_v11 }
  0x84   : > { %795 = vmatpush3.bf16.msra.mxu0 %v794_v53  ;;  %v832_v36 = vpack.c.bf16 %v454_v35, %v452_v34  ;;  %v453_v38 = vld [vmem:[#allocation7 + $0xf0] sm:$0xff]  ;;  %v717_v42 = vld [vmem:[%s1386_s2] ss:$0 sm:$0xff] }
  0x85   : > { %797 = vmatprep.subr.bf16.mxu0 %v796_v54  ;;  %819 = vmatpush1.bf16.msra.mxu1 %v818_v15  ;;  %v834_v39 = vpack.c.bf16 %v453_v38, %v451_v37  ;;  %v455_v13 = vld [vmem:[%s1388_s4] sm:$0x3] }
  0x86   : > { %821 = vmatprep.subr.bf16.mxu1 %v820_v18  ;;  %v460_v15 = vrot.slane %v455_v13, %v459_v12  ;;  %v464_v16 = vrot.slane %v455_v13, %v463_v14 }
  0x88   : > { %799 = vmatpush3.bf16.msra.mxu0 %v798_v59 }
  0x89   : > { %801 = vmatprep.subr.bf16.mxu0 %v800_v60  ;;  %823 = vmatpush1.bf16.msra.mxu1 %v822_v21 }
  0x8a   : > { %825 = vmatprep.subr.bf16.mxu1 %v824_v24 }
  0x8c   : > { %803 = vmatpush3.bf16.msra.mxu0 %v802_v63 }
  0x8d   : > { %827 = vmatpush1.bf16.msra.mxu1 %v826_v27 }
  0x8e   : > { %829 = vmatprep.subr.bf16.mxu1 %v828_v30 }
  0x8f   : > { %387 = vmatmul.mubr.f32.vlgmr.msra.gmra.mrb[0].mxu0 %v275_v0 }
  0x90   : > { %391 = vmatprep.mubr.f32.mxu0 %v278_v1 }
  0x91   : > { %831 = vmatpush1.bf16.msra.mxu1 %v830_v33 }
  0x92   : > { %833 = vmatprep.subr.bf16.mxu1 %v832_v36 }
  0x93   : > { %392 = vmatmul.mubr.f32.gmra.mrb[2].mxu0 %v277_v2 }
  0x94   : > { %396 = vmatprep.mubr.f32.mxu0 %v280_v3 }
  0x95   : > { %835 = vmatpush1.bf16.msra.mxu1 %v834_v39 }
  0x97   : > { %397 = vmatmul.mubr.f32.gmra.mrb[4].mxu0 %v279_v4 }
  0x98   : > { %401 = vmatprep.mubr.f32.mxu0 %v282_v5 }
  0x9b   : > { %402 = vmatmul.mubr.f32.gmra.mrb[6].mxu0 %v281_v6 }
 0x162   : > { %v760_v41 = vpop.f32.mrb[0].mxu0 }
 0x163   : > { %v761_v43 = vpop.f32.mrb[1].mxu0 }
 0x164   : > { %v762_v44 = vadd.f32 %v761_v43, %v760_v41 }
 0x166   : > { %v389_v45 = vadd.f32 %v762_v44, %v717_v42  ;;  %v763_v46 = vpop.f32.mrb[2].mxu0 }
 0x167   : > { %v764_v47 = vpop.f32.mrb[3].mxu0 }
 0x168   : > { %v407_v48 = vmul.f32 0.5, %v389_v45  ;;  %v765_v49 = vadd.f32 %v764_v47, %v763_v46 }
 0x16a   : > { %910 = vtanh.f32 %v407_v48  ;;  %v394_v50 = vadd.f32 %v765_v49, %v717_v42  ;;  %v766_v51 = vpop.f32.mrb[4].mxu0 }
 0x16b   : > { %v767_v52 = vpop.f32.mrb[5].mxu0 }
 0x16c   : > { %v408_v53 = vmul.f32 0.5, %v394_v50  ;;  %v768_v54 = vadd.f32 %v767_v52, %v766_v51 }
 0x16e   : > { %912 = vtanh.f32 %v408_v53  ;;  %v399_v55 = vadd.f32 %v768_v54, %v717_v42  ;;  %v769_v56 = vpop.f32.mrb[6].mxu0 }
 0x16f   : > { %v770_v57 = vpop.f32.mrb[7].mxu0 }
 0x170   : > { %v409_v58 = vmul.f32 0.5, %v399_v55  ;;  %v771_v59 = vadd.f32 %v770_v57, %v769_v56 }
 0x172   : > { %914 = vtanh.f32 %v409_v58  ;;  %v404_v60 = vadd.f32 %v771_v59, %v717_v42 }
 0x174   : > { %v911_v61 = vpop.eup %910  ;;  %v410_v62 = vmul.f32 0.5, %v404_v60 }
 0x175   : > { %v415_v63 = vmul.f32 0.5, %v911_v61 }
 0x176   : > { %916 = vtanh.f32 %v410_v62 }
 0x177   : > { %v419_v0 = vadd.f32 0.5, %v415_v63 }
 0x178   : > { %v913_v1 = vpop.eup %912 }
 0x179   : > { %532 = vmatmul.mubr.f32.vlgmr.msra.gmra.mrb[0].mxu1 %v419_v0  ;;  %v416_v2 = vmul.f32 0.5, %v913_v1 }
 0x17a   : > { %537 = vmatprep.mubr.f32.mxu1 %v1099_v40 }
 0x17b   : > { %v420_v3 = vadd.f32 0.5, %v416_v2 }
 0x17c   : > { %v915_v4 = vpop.eup %914 }
 0x17d   : > { %538 = vmatmul.mubr.f32.gmra.mrb[2].mxu1 %v420_v3  ;;  %v417_v5 = vmul.f32 0.5, %v915_v4 }
 0x17e   : > { %543 = vmatprep.mubr.f32.mxu1 %v1099_v40 }
 0x17f   : > { %v421_v6 = vadd.f32 0.5, %v417_v5 }
 0x180   : > { %v917_v7 = vpop.eup %916 }
 0x181   : > { %544 = vmatmul.mubr.f32.gmra.mrb[4].mxu1 %v421_v6  ;;  %v418_v8 = vmul.f32 0.5, %v917_v7 }
 0x182   : > { %549 = vmatprep.mubr.f32.mxu1 %v1099_v40 }
 0x183   : > { %v422_v9 = vadd.f32 0.5, %v418_v8 }
 0x185   : > { %550 = vmatmul.mubr.f32.gmra.mrb[6].mxu1 %v422_v9 }
 0x24c   : > { %v533_v17 = vpop.f32.mrb[0].mxu1 }
 0x24d   : > { %v534_v18 = vadd.f32 %v533_v17, %v460_v15  ;;  %v535_v19 = vpop.f32.mrb[1].mxu1 }
 0x24e   : > { %v536_v20 = vadd.f32 %v535_v19, %v464_v16 }
 0x24f   : > { %v556_v21 = vmul.f32 0.5, %v534_v18 }
 0x250   : > { %v557_v22 = vmul.f32 0.5, %v536_v20  ;;  %v539_v23 = vpop.f32.mrb[2].mxu1 }
 0x251   : > { %918 = vtanh.f32 %v556_v21  ;;  %v540_v24 = vadd.f32 %v539_v23, %v460_v15  ;;  %v541_v25 = vpop.f32.mrb[3].mxu1 }
 0x252   : > { %920 = vtanh.f32 %v557_v22  ;;  %v542_v26 = vadd.f32 %v541_v25, %v464_v16 }
 0x253   : > { %v558_v27 = vmul.f32 0.5, %v540_v24 }
 0x254   : > { %v559_v28 = vmul.f32 0.5, %v542_v26  ;;  %v545_v29 = vpop.f32.mrb[4].mxu1 }
 0x255   : > { %922 = vtanh.f32 %v558_v27  ;;  %v546_v30 = vadd.f32 %v545_v29, %v460_v15  ;;  %v547_v31 = vpop.f32.mrb[5].mxu1 }
 0x256   : > { %924 = vtanh.f32 %v559_v28  ;;  %v548_v32 = vadd.f32 %v547_v31, %v464_v16 }
 0x257   : > { %v560_v33 = vmul.f32 0.5, %v546_v30 }
 0x258   : > { %v561_v34 = vmul.f32 0.5, %v548_v32  ;;  %v551_v35 = vpop.f32.mrb[6].mxu1 }
 0x259   : > { %926 = vtanh.f32 %v560_v33  ;;  %v552_v36 = vadd.f32 %v551_v35, %v460_v15  ;;  %v553_v37 = vpop.f32.mrb[7].mxu1 }
 0x25a   : > { %928 = vtanh.f32 %v561_v34  ;;  %v554_v38 = vadd.f32 %v553_v37, %v464_v16 }
 0x25b   : > { %v919_v39 = vpop.eup %918  ;;  %v562_v40 = vmul.f32 0.5, %v552_v36 }
 0x25c   : > { %v921_v41 = vpop.eup %920  ;;  %v572_v42 = vmul.f32 0.5, %v919_v39  ;;  %v563_v43 = vmul.f32 0.5, %v554_v38 }
 0x25d   : > { %v573_v44 = vmul.f32 0.5, %v921_v41  ;;  %930 = vtanh.f32 %v562_v40 }
 0x25e   : > { %v580_v45 = vadd.f32 0.5, %v572_v42  ;;  %932 = vtanh.f32 %v563_v43 }
 0x25f   : > { %v923_v46 = vpop.eup %922  ;;  %v581_v47 = vadd.f32 0.5, %v573_v44 }
 0x260   : > { %v925_v48 = vpop.eup %924  ;;  %588 = vst [vmem:[%s272_s10] sm:$0xff] %v580_v45  ;;  %v574_v49 = vmul.f32 0.5, %v923_v46 }
 0x261   : > { %589 = vst [vmem:[%s272_s10 + $0x8] sm:$0xff] %v581_v47  ;;  %v575_v50 = vmul.f32 0.5, %v925_v48 }
 0x262   : > { %v582_v51 = vadd.f32 0.5, %v574_v49 }
 0x263   : > { %v927_v52 = vpop.eup %926  ;;  %v583_v53 = vadd.f32 0.5, %v575_v50 }
 0x264   : > { %v929_v54 = vpop.eup %928  ;;  %590 = vst [vmem:[%s272_s10 + $0x10] sm:$0xff] %v582_v51  ;;  %v576_v55 = vmul.f32 0.5, %v927_v52 }
 0x265   : > { %591 = vst [vmem:[%s272_s10 + $0x18] sm:$0xff] %v583_v53  ;;  %v577_v56 = vmul.f32 0.5, %v929_v54 }
 0x266   : > { %v584_v57 = vadd.f32 0.5, %v576_v55 }
 0x267   : > { %v931_v58 = vpop.eup %930  ;;  %v585_v59 = vadd.f32 0.5, %v577_v56 }
 0x268   : > { %v933_v60 = vpop.eup %932  ;;  %592 = vst [vmem:[%s272_s10 + $0x20] sm:$0xff] %v584_v57  ;;  %v578_v61 = vmul.f32 0.5, %v931_v58 }
 0x269   : > { %593 = vst [vmem:[%s272_s10 + $0x28] sm:$0xff] %v585_v59  ;;  %v579_v62 = vmul.f32 0.5, %v933_v60 }
 0x26a   : > { %v586_v63 = vadd.f32 0.5, %v578_v61 }
 0x26b   : > { %v587_v0 = vadd.f32 0.5, %v579_v62 }
 0x26c   : > { %594 = vst [vmem:[%s272_s10 + $0x30] sm:$0xff] %v586_v63 }
 0x26d   : > { %595 = vst [vmem:[%s272_s10 + $0x38] sm:$0xff] %v587_v0 }
 0x26e   : > { %1033 = shalt.err (!%p1030_p7)
}
 0x26f   : > { %s1034_s14 = scalar_lea.hbm %s1339_s11, 1024  ;;  %s1038_s12 = scalar_lea.hbm %s1389_s5, 3072 }
 0x270   : > { %p1035_p9 = scmp.ne.s32.totalorder %s1339_s11, %s1034_s14  ;;  %p1039_p5 = scmp.lt.u32.totalorder %s1339_s11, %s1389_s5 }
 0x271   : > { %p1040_p10 = scmp.lt.u32.totalorder %s1038_s12, %s1034_s14  ;;  %p1042_p1 = scmp.lt.u32.totalorder %s1034_s14, %s1339_s11 }
 0x272   : > { %p1036_p12 = pnand %p1035_p9, %p1251_p6 }
 0x273   : > { %p1041_p11 = por %p1040_p10, %p1039_p5 }
 0x274   : > { %p1037_p0 = pneg %p1036_p12 }
 0x275   : > { %p1043_p2 = por %p1042_p1, %p1041_p11 }
 0x277   : > { %p1044_p4 = pnand %p1043_p2, %p1037_p0 }
 0x279   : > { %1047 = shalt.err (!%p1044_p4)
}
 0x27a   : > { %s1101_s28 = smov 256   ;;  %s1102_s9 = smov 16  }
 0x27b   : > { %846 = dma.vmem_to_hbm [thread:$0]  (%p1251_p6), %s1341_s15, 1024, %s1339_s11, %s597_s22, %s1101_s28, %s1101_s28, %s1102_s9  }
 0x27c PF: > { %p868_p8 = scmp.ge.s32.totalorder %s1090_s21, 2  ;;  %s626_s30 = sand.u32 1, %s1078_s18  }
 0x27d   : > { %p1404_p13 = scmp.ne.s32.totalorder %s1394_s25, 0  ;;  %s627_s23 = scalar_lea.sflag [#allocation4], %s626_s30 }
 0x27f   : > { %p860_p3 = pnand %p868_p8, %p1404_p13 }
 0x281   : > { %1073 = dma.done.wait (!%p860_p3), %s627_s23, 1024  }
 0x282   : > { %1075 = vsyncadd (!%p860_p3), %s627_s23, 4294966272  ;;  %p19_p7 = scmp.ge.s32.totalorder %s1238_s16, 5   ;;  %s1405_s18 = smov %s1082_s19 }
 0x283   : > { %s1406_s19 = smov %s1086_s20  ;;  %s1407_s20 = smov %s1247_s27 }
 0x284   : > { %s1408_s21 = smov %s1238_s16  ;;  %21 = sbr.rel (!%p19_p7) target bundleno = 6 (0x6), region = 93 }
 0x28b   :  { %632 = vsyncpa [#allocation3], 1 }
 0x28c   :  { %634 = vsyncpa [#allocation3 + $0x1], 1 }
 0x28d   :  { %635 = vsyncpa [#allocation6], 1 }
 0x28e   :  { %636 = vsyncpa [#allocation4], 1 }
 0x28f   :  { %638 = vsyncpa [#allocation4 + $0x1], 1 }

</bundles_post_ra>
